<compile_context>
chip_gen: v6e
topology: v6e:2x2x1
jax: 0.10.0
libtpu: 0.0.40
codegen_flags: <defaults>
</compile_context>

<pallas_src>
import jax
import jax.numpy as jnp
from jax.experimental import pallas as pl
from jax.experimental.pallas import tpu as pltpu


def build_spatial_conv_matrix(w_sa, H, W):
    """Fold the 2-channel kxk 'same' conv into a (2*H*W, H*W) matrix.

    kmat[c*HW + j, i] = w_sa[0, c, y_j - y_i + p, x_j - x_i + p] if in range, else 0,
    so that  conv(cat)[n, i] == sum_{c,j} cat[n, c, j] * kmat[c*HW + j, i]
    (cross-correlation with zero padding p = (k-1)//2, exactly like lax.conv).
    """
    k = w_sa.shape[-1]
    p = (k - 1) // 2
    HW = H * W
    idx = jnp.arange(HW)
    y, x = idx // W, idx % W
    dy = y[:, None] - y[None, :] + p          # [j, i] -> ky
    dx = x[:, None] - x[None, :] + p          # [j, i] -> kx
    valid = (dy >= 0) & (dy < k) & (dx >= 0) & (dx < k)
    dyc = jnp.clip(dy, 0, k - 1)
    dxc = jnp.clip(dx, 0, k - 1)
    w2 = w_sa[0].astype(jnp.float32)          # (2, k, k)
    kmat = jnp.where(valid[None, :, :], w2[:, dyc, dxc], 0.0)   # (2, HW, HW)
    return kmat.reshape(2 * HW, HW)


def cbam_kernel(x_ref, w1t_ref, w2t_ref, kmat_ref, o_ref):
    f32 = jnp.float32
    x = x_ref[...].astype(f32)                    # (Nb, C, HW), lane-dense last dim
    Nb = x.shape[0]

    # ---------------- Channel attention ----------------
    # Global avg / max pool: single flat reductions over the 256-lane axis.
    avg = jnp.mean(x, axis=-1)                    # (Nb, C)
    mx = jnp.max(x, axis=-1)                      # (Nb, C)

    # Shared 2-layer MLP, batched over {avg, max} x Nb samples -> 2 MXU matmuls.
    pooled = jnp.concatenate([avg, mx], axis=0)   # (2*Nb, C)
    h = jnp.maximum(
        jnp.dot(pooled, w1t_ref[...], preferred_element_type=f32), 0.0)   # (2*Nb, Ch)
    o = jnp.dot(h, w2t_ref[...], preferred_element_type=f32)              # (2*Nb, C)
    ca = jax.nn.sigmoid(o[:Nb, :] + o[Nb:, :])    # (Nb, C)

    # Stage x1 = x * ca in the lane-dense output block (bounds vreg live ranges).
    o_ref[...] = (x * ca[:, :, None]).astype(o_ref.dtype)

    # ---------------- Spatial attention ----------------
    # Per-sample mean/max over channels (2-D sublane reductions on lane-dense
    # slabs), concatenated along lanes into the (avg | max) conv-input row.
    rows = []
    for n in range(Nb):                           # small static unroll (Nb <= 8)
        xn = o_ref[n].astype(f32)                 # (C, HW)
        rows.append(jnp.concatenate(
            [jnp.mean(xn, axis=0, keepdims=True),
             jnp.max(xn, axis=0, keepdims=True)], axis=1))     # (1, 2*HW)
    cat = jnp.concatenate(rows, axis=0)           # (Nb, 2*HW)

    # 7x7 'same' conv over the 2-channel map == one lane-dense MXU matmul against
    # the precomputed (2*HW, HW) matrix.
    sa = jax.nn.sigmoid(
        jnp.dot(cat, kmat_ref[...], preferred_element_type=f32))          # (Nb, HW)

    o_ref[...] = (o_ref[...].astype(f32) * sa[:, None, :]).astype(o_ref.dtype)


def res_block_cbam(x, w1, w2, w_sa, *, block_n=8):
    """x: (N, C, H, W); w1: (C//r, C); w2: (C, C//r); w_sa: (1, 2, k, k)."""
    N, C, H, W = x.shape
    Ch = w1.shape[0]
    HW = H * W

    # Batch blocking; keep >= 2 grid steps when possible (v7x has 2 TensorCores).
    Nb = max(1, min(block_n, N))
    if N >= 2 and pl.cdiv(N, Nb) < 2:
        Nb = pl.cdiv(N, 2)
    Np = pl.cdiv(N, Nb) * Nb

    x3 = x.reshape(N, C, HW)                      # layout plumbing only (free)
    if Np != N:
        x3 = jnp.pad(x3, ((0, Np - N), (0, 0), (0, 0)))

    w1t = jnp.asarray(w1, jnp.float32).T          # (C, Ch)
    w2t = jnp.asarray(w2, jnp.float32).T          # (Ch, C)
    kmat = build_spatial_conv_matrix(w_sa, H, W)  # (2*HW, HW), f32

    out3 = pl.pallas_call(
        cbam_kernel,
        out_shape=jax.ShapeDtypeStruct((Np, C, HW), x.dtype),
        grid_spec=pltpu.PrefetchScalarGridSpec(
            num_scalar_prefetch=0,
            grid=(Np // Nb,),
            in_specs=[
                pl.BlockSpec((Nb, C, HW), lambda n: (n, 0, 0)),
                pl.BlockSpec((C, Ch), lambda n: (0, 0)),       # resident across grid
                pl.BlockSpec((Ch, C), lambda n: (0, 0)),       # resident across grid
                pl.BlockSpec((2 * HW, HW), lambda n: (0, 0)),  # resident across grid
            ],
            out_specs=pl.BlockSpec((Nb, C, HW), lambda n: (n, 0, 0)),
        ),
        compiler_params=pltpu.CompilerParams(
            dimension_semantics=("parallel",)),
    )(x3, w1t, w2t, kmat)

    return out3[:N].reshape(N, C, H, W)


def cbam_reference(x, w1, w2, w_sa):
    """Pure-JAX reference mirroring the PyTorch forward."""
    k = w_sa.shape[-1]
    p = (k - 1) // 2
    avg = x.mean(axis=(2, 3))                                    # (N, C)
    mx = x.max(axis=(2, 3))                                      # (N, C)

    def fc(v):
        h = jnp.maximum(v @ w1.T, 0.0)
        return h @ w2.T

    ca = jax.nn.sigmoid(fc(avg) + fc(mx))                        # (N, C)
    x1 = x * ca[:, :, None, None]

    avg_c = x1.mean(axis=1, keepdims=True)
    max_c = x1.max(axis=1, keepdims=True)
    cat = jnp.concatenate([avg_c, max_c], axis=1)                # (N, 2, H, W)
    sa = jax.lax.conv_general_dilated(
        cat, w_sa, window_strides=(1, 1), padding=[(p, p), (p, p)],
        dimension_numbers=("NCHW", "OIHW", "NCHW"))
    sa = jax.nn.sigmoid(sa)                                      # (N, 1, H, W)
    return x1 * sa


if __name__ == "__main__":
    N, C, H, W = 16, 32, 16, 16     # in_channels=32, ratio=16 -> hidden=2
    ratio, k = 16, 7

    key = jax.random.PRNGKey(0)
    kx, k1, k2, k3 = jax.random.split(key, 4)

    x = jax.random.normal(kx, (N, C, H, W), dtype=jnp.float32)
    w1 = jax.random.normal(k1, (C // ratio, C), dtype=jnp.float32) * 0.1   # fc1 (1x1 conv)
    w2 = jax.random.normal(k2, (C, C // ratio), dtype=jnp.float32) * 0.1   # fc2 (1x1 conv)
    w_sa = jax.random.normal(k3, (1, 2, k, k), dtype=jnp.float32) * 0.1    # 7x7 conv

    out = jax.block_until_ready(jax.jit(res_block_cbam)(x, w1, w2, w_sa))

    ref = cbam_reference(x, w1, w2, w_sa)
    assert out.shape == (N, C, H, W)
    assert jnp.allclose(out, ref, atol=2e-3, rtol=2e-3), "mismatch vs reference"

    print("KERNEL_OK")
</pallas_src>

<mosaic_0001>
module attributes {stable_mosaic.version = 11 : i64} {
  func.func @cbam_kernel(%arg0: i32, %arg1: memref<8x32x256xf32, #tpu.memory_space<vmem>>, %arg2: memref<32x2xf32, #tpu.memory_space<vmem>>, %arg3: memref<2x32xf32, #tpu.memory_space<vmem>>, %arg4: memref<512x256xf32, #tpu.memory_space<vmem>>, %arg5: memref<8x32x256xf32, #tpu.memory_space<vmem>>) attributes {dimension_semantics = [#tpu.dimension_semantics<parallel>], iteration_bounds = array<i64: 2>, scalar_prefetch = 0 : i64, scratch_operands = 0 : i64, tpu.core_type = #tpu.core_type<tc>, window_params = [{transform_indices = @transform_0, window_bounds = array<i64: 8, 32, 256>}, {pipeline_mode = #tpu.pipeline_mode<synchronous>, transform_indices = @transform_1, window_bounds = array<i64: 32, 2>}, {pipeline_mode = #tpu.pipeline_mode<synchronous>, transform_indices = @transform_2, window_bounds = array<i64: 2, 32>}, {pipeline_mode = #tpu.pipeline_mode<synchronous>, transform_indices = @transform_3, window_bounds = array<i64: 512, 256>}, {transform_indices = @transform_4, window_bounds = array<i64: 8, 32, 256>}]} {
    %c0 = arith.constant 0 : index
    %c0_0 = arith.constant 0 : index
    %c0_1 = arith.constant 0 : index
    %0 = vector.load %arg1[%c0, %c0_0, %c0_1] : memref<8x32x256xf32, #tpu.memory_space<vmem>>, vector<8x32x256xf32>
    %cst = arith.constant dense<0.000000e+00> : vector<8x32xf32>
    %1 = vector.multi_reduction <add>, %0, %cst [2] : vector<8x32x256xf32> to vector<8x32xf32>
    %cst_2 = arith.constant 2.560000e+02 : f32
    %2 = vector.broadcast %cst_2 : f32 to vector<8x32xf32>
    %3 = arith.divf %1, %2 : vector<8x32xf32>
    %cst_3 = arith.constant dense<0xFF800000> : vector<8x32xf32>
    %4 = vector.multi_reduction <maximumf>, %0, %cst_3 [2] : vector<8x32x256xf32> to vector<8x32xf32>
    %5 = tpu.concatenate %3, %4 in 0 : vector<8x32xf32>, vector<8x32xf32> -> vector<16x32xf32>
    %c0_4 = arith.constant 0 : index
    %c0_5 = arith.constant 0 : index
    %6 = vector.load %arg2[%c0_4, %c0_5] : memref<32x2xf32, #tpu.memory_space<vmem>>, vector<32x2xf32>
    %cst_6 = arith.constant dense<0.000000e+00> : vector<16x2xf32>
    %7 = tpu.matmul %5, %6, %cst_6 {dimension_numbers = #tpu.dot_dimension_numbers<[1], [0], [0], [1], [0, 0, 1, 1], [], []>} : vector<16x32xf32>, vector<32x2xf32>, vector<16x2xf32> -> vector<16x2xf32>
    %cst_7 = arith.constant 0.000000e+00 : f32
    %8 = vector.broadcast %cst_7 : f32 to vector<16x2xf32>
    %9 = arith.maximumf %7, %8 : vector<16x2xf32>
    %c0_8 = arith.constant 0 : index
    %c0_9 = arith.constant 0 : index
    %10 = vector.load %arg3[%c0_8, %c0_9] : memref<2x32xf32, #tpu.memory_space<vmem>>, vector<2x32xf32>
    %cst_10 = arith.constant dense<0.000000e+00> : vector<16x32xf32>
    %11 = tpu.matmul %9, %10, %cst_10 {dimension_numbers = #tpu.dot_dimension_numbers<[1], [0], [0], [1], [0, 0, 1, 1], [], []>} : vector<16x2xf32>, vector<2x32xf32>, vector<16x32xf32> -> vector<16x32xf32>
    %12 = vector.extract_strided_slice %11 {offsets = [0, 0], sizes = [8, 32], strides = [1, 1]} : vector<16x32xf32> to vector<8x32xf32>
    %13 = vector.extract_strided_slice %11 {offsets = [8, 0], sizes = [8, 32], strides = [1, 1]} : vector<16x32xf32> to vector<8x32xf32>
    %14 = arith.addf %12, %13 : vector<8x32xf32>
    %15 = arith.negf %14 : vector<8x32xf32>
    %16 = math.exp %15 : vector<8x32xf32>
    %cst_11 = arith.constant 1.000000e+00 : f32
    %17 = vector.broadcast %cst_11 : f32 to vector<8x32xf32>
    %18 = arith.addf %17, %16 : vector<8x32xf32>
    %19 = arith.divf %17, %18 : vector<8x32xf32>
    %20 = vector.shape_cast %19 : vector<8x32xf32> to vector<8x32x1xf32>
    %21 = vector.broadcast %20 : vector<8x32x1xf32> to vector<8x32x256xf32>
    %22 = arith.mulf %0, %21 : vector<8x32x256xf32>
    %c0_12 = arith.constant 0 : index
    %c0_13 = arith.constant 0 : index
    %c0_14 = arith.constant 0 : index
    %23 = vector.load %arg5[%c0_12, %c0_13, %c0_14] : memref<8x32x256xf32, #tpu.memory_space<vmem>>, vector<8x32x256xf32>
    tpu.vector_store %arg5[%c0_12, %c0_13, %c0_14], %22 {strides = array<i32>} : memref<8x32x256xf32, #tpu.memory_space<vmem>>, vector<8x32x256xf32>,
    %c0_15 = arith.constant 0 : index
    %c0_16 = arith.constant 0 : index
    %c0_17 = arith.constant 0 : index
    %24 = vector.load %arg5[%c0_15, %c0_16, %c0_17] : memref<8x32x256xf32, #tpu.memory_space<vmem>>, vector<1x32x256xf32>
    %25 = vector.shape_cast %24 : vector<1x32x256xf32> to vector<32x256xf32>
    %cst_18 = arith.constant dense<0.000000e+00> : vector<256xf32>
    %26 = vector.multi_reduction <add>, %25, %cst_18 [0] : vector<32x256xf32> to vector<256xf32>
    %27 = vector.shape_cast %26 : vector<256xf32> to vector<1x256xf32>
    %cst_19 = arith.constant 3.200000e+01 : f32
    %28 = vector.broadcast %cst_19 : f32 to vector<1x256xf32>
    %29 = arith.divf %27, %28 : vector<1x256xf32>
    %cst_20 = arith.constant dense<0xFF800000> : vector<256xf32>
    %30 = vector.multi_reduction <maximumf>, %25, %cst_20 [0] : vector<32x256xf32> to vector<256xf32>
    %31 = vector.shape_cast %30 : vector<256xf32> to vector<1x256xf32>
    %32 = tpu.concatenate %29, %31 in 1 : vector<1x256xf32>, vector<1x256xf32> -> vector<1x512xf32>
    %c1 = arith.constant 1 : index
    %c0_21 = arith.constant 0 : index
    %c0_22 = arith.constant 0 : index
    %33 = vector.load %arg5[%c1, %c0_21, %c0_22] : memref<8x32x256xf32, #tpu.memory_space<vmem>>, vector<1x32x256xf32>
    %34 = vector.shape_cast %33 : vector<1x32x256xf32> to vector<32x256xf32>
    %cst_23 = arith.constant dense<0.000000e+00> : vector<256xf32>
    %35 = vector.multi_reduction <add>, %34, %cst_23 [0] : vector<32x256xf32> to vector<256xf32>
    %36 = vector.shape_cast %35 : vector<256xf32> to vector<1x256xf32>
    %cst_24 = arith.constant 3.200000e+01 : f32
    %37 = vector.broadcast %cst_24 : f32 to vector<1x256xf32>
    %38 = arith.divf %36, %37 : vector<1x256xf32>
    %cst_25 = arith.constant dense<0xFF800000> : vector<256xf32>
    %39 = vector.multi_reduction <maximumf>, %34, %cst_25 [0] : vector<32x256xf32> to vector<256xf32>
    %40 = vector.shape_cast %39 : vector<256xf32> to vector<1x256xf32>
    %41 = tpu.concatenate %38, %40 in 1 : vector<1x256xf32>, vector<1x256xf32> -> vector<1x512xf32>
    %c2 = arith.constant 2 : index
    %c0_26 = arith.constant 0 : index
    %c0_27 = arith.constant 0 : index
    %42 = vector.load %arg5[%c2, %c0_26, %c0_27] : memref<8x32x256xf32, #tpu.memory_space<vmem>>, vector<1x32x256xf32>
    %43 = vector.shape_cast %42 : vector<1x32x256xf32> to vector<32x256xf32>
    %cst_28 = arith.constant dense<0.000000e+00> : vector<256xf32>
    %44 = vector.multi_reduction <add>, %43, %cst_28 [0] : vector<32x256xf32> to vector<256xf32>
    %45 = vector.shape_cast %44 : vector<256xf32> to vector<1x256xf32>
    %cst_29 = arith.constant 3.200000e+01 : f32
    %46 = vector.broadcast %cst_29 : f32 to vector<1x256xf32>
    %47 = arith.divf %45, %46 : vector<1x256xf32>
    %cst_30 = arith.constant dense<0xFF800000> : vector<256xf32>
    %48 = vector.multi_reduction <maximumf>, %43, %cst_30 [0] : vector<32x256xf32> to vector<256xf32>
    %49 = vector.shape_cast %48 : vector<256xf32> to vector<1x256xf32>
    %50 = tpu.concatenate %47, %49 in 1 : vector<1x256xf32>, vector<1x256xf32> -> vector<1x512xf32>
    %c3 = arith.constant 3 : index
    %c0_31 = arith.constant 0 : index
    %c0_32 = arith.constant 0 : index
    %51 = vector.load %arg5[%c3, %c0_31, %c0_32] : memref<8x32x256xf32, #tpu.memory_space<vmem>>, vector<1x32x256xf32>
    %52 = vector.shape_cast %51 : vector<1x32x256xf32> to vector<32x256xf32>
    %cst_33 = arith.constant dense<0.000000e+00> : vector<256xf32>
    %53 = vector.multi_reduction <add>, %52, %cst_33 [0] : vector<32x256xf32> to vector<256xf32>
    %54 = vector.shape_cast %53 : vector<256xf32> to vector<1x256xf32>
    %cst_34 = arith.constant 3.200000e+01 : f32
    %55 = vector.broadcast %cst_34 : f32 to vector<1x256xf32>
    %56 = arith.divf %54, %55 : vector<1x256xf32>
    %cst_35 = arith.constant dense<0xFF800000> : vector<256xf32>
    %57 = vector.multi_reduction <maximumf>, %52, %cst_35 [0] : vector<32x256xf32> to vector<256xf32>
    %58 = vector.shape_cast %57 : vector<256xf32> to vector<1x256xf32>
    %59 = tpu.concatenate %56, %58 in 1 : vector<1x256xf32>, vector<1x256xf32> -> vector<1x512xf32>
    %c4 = arith.constant 4 : index
    %c0_36 = arith.constant 0 : index
    %c0_37 = arith.constant 0 : index
    %60 = vector.load %arg5[%c4, %c0_36, %c0_37] : memref<8x32x256xf32, #tpu.memory_space<vmem>>, vector<1x32x256xf32>
    %61 = vector.shape_cast %60 : vector<1x32x256xf32> to vector<32x256xf32>
    %cst_38 = arith.constant dense<0.000000e+00> : vector<256xf32>
    %62 = vector.multi_reduction <add>, %61, %cst_38 [0] : vector<32x256xf32> to vector<256xf32>
    %63 = vector.shape_cast %62 : vector<256xf32> to vector<1x256xf32>
    %cst_39 = arith.constant 3.200000e+01 : f32
    %64 = vector.broadcast %cst_39 : f32 to vector<1x256xf32>
    %65 = arith.divf %63, %64 : vector<1x256xf32>
    %cst_40 = arith.constant dense<0xFF800000> : vector<256xf32>
    %66 = vector.multi_reduction <maximumf>, %61, %cst_40 [0] : vector<32x256xf32> to vector<256xf32>
    %67 = vector.shape_cast %66 : vector<256xf32> to vector<1x256xf32>
    %68 = tpu.concatenate %65, %67 in 1 : vector<1x256xf32>, vector<1x256xf32> -> vector<1x512xf32>
    %c5 = arith.constant 5 : index
    %c0_41 = arith.constant 0 : index
    %c0_42 = arith.constant 0 : index
    %69 = vector.load %arg5[%c5, %c0_41, %c0_42] : memref<8x32x256xf32, #tpu.memory_space<vmem>>, vector<1x32x256xf32>
    %70 = vector.shape_cast %69 : vector<1x32x256xf32> to vector<32x256xf32>
    %cst_43 = arith.constant dense<0.000000e+00> : vector<256xf32>
    %71 = vector.multi_reduction <add>, %70, %cst_43 [0] : vector<32x256xf32> to vector<256xf32>
    %72 = vector.shape_cast %71 : vector<256xf32> to vector<1x256xf32>
    %cst_44 = arith.constant 3.200000e+01 : f32
    %73 = vector.broadcast %cst_44 : f32 to vector<1x256xf32>
    %74 = arith.divf %72, %73 : vector<1x256xf32>
    %cst_45 = arith.constant dense<0xFF800000> : vector<256xf32>
    %75 = vector.multi_reduction <maximumf>, %70, %cst_45 [0] : vector<32x256xf32> to vector<256xf32>
    %76 = vector.shape_cast %75 : vector<256xf32> to vector<1x256xf32>
    %77 = tpu.concatenate %74, %76 in 1 : vector<1x256xf32>, vector<1x256xf32> -> vector<1x512xf32>
    %c6 = arith.constant 6 : index
    %c0_46 = arith.constant 0 : index
    %c0_47 = arith.constant 0 : index
    %78 = vector.load %arg5[%c6, %c0_46, %c0_47] : memref<8x32x256xf32, #tpu.memory_space<vmem>>, vector<1x32x256xf32>
    %79 = vector.shape_cast %78 : vector<1x32x256xf32> to vector<32x256xf32>
    %cst_48 = arith.constant dense<0.000000e+00> : vector<256xf32>
    %80 = vector.multi_reduction <add>, %79, %cst_48 [0] : vector<32x256xf32> to vector<256xf32>
    %81 = vector.shape_cast %80 : vector<256xf32> to vector<1x256xf32>
    %cst_49 = arith.constant 3.200000e+01 : f32
    %82 = vector.broadcast %cst_49 : f32 to vector<1x256xf32>
    %83 = arith.divf %81, %82 : vector<1x256xf32>
    %cst_50 = arith.constant dense<0xFF800000> : vector<256xf32>
    %84 = vector.multi_reduction <maximumf>, %79, %cst_50 [0] : vector<32x256xf32> to vector<256xf32>
    %85 = vector.shape_cast %84 : vector<256xf32> to vector<1x256xf32>
    %86 = tpu.concatenate %83, %85 in 1 : vector<1x256xf32>, vector<1x256xf32> -> vector<1x512xf32>
    %c7 = arith.constant 7 : index
    %c0_51 = arith.constant 0 : index
    %c0_52 = arith.constant 0 : index
    %87 = vector.load %arg5[%c7, %c0_51, %c0_52] : memref<8x32x256xf32, #tpu.memory_space<vmem>>, vector<1x32x256xf32>
    %88 = vector.shape_cast %87 : vector<1x32x256xf32> to vector<32x256xf32>
    %cst_53 = arith.constant dense<0.000000e+00> : vector<256xf32>
    %89 = vector.multi_reduction <add>, %88, %cst_53 [0] : vector<32x256xf32> to vector<256xf32>
    %90 = vector.shape_cast %89 : vector<256xf32> to vector<1x256xf32>
    %cst_54 = arith.constant 3.200000e+01 : f32
    %91 = vector.broadcast %cst_54 : f32 to vector<1x256xf32>
    %92 = arith.divf %90, %91 : vector<1x256xf32>
    %cst_55 = arith.constant dense<0xFF800000> : vector<256xf32>
    %93 = vector.multi_reduction <maximumf>, %88, %cst_55 [0] : vector<32x256xf32> to vector<256xf32>
    %94 = vector.shape_cast %93 : vector<256xf32> to vector<1x256xf32>
    %95 = tpu.concatenate %92, %94 in 1 : vector<1x256xf32>, vector<1x256xf32> -> vector<1x512xf32>
    %96 = tpu.concatenate %32, %41, %50, %59, %68, %77, %86, %95 in 0 : vector<1x512xf32>, vector<1x512xf32>, vector<1x512xf32>, vector<1x512xf32>, vector<1x512xf32>, vector<1x512xf32>, vector<1x512xf32>, vector<1x512xf32> -> vector<8x512xf32>
    %c0_56 = arith.constant 0 : index
    %c0_57 = arith.constant 0 : index
    %97 = vector.load %arg4[%c0_56, %c0_57] : memref<512x256xf32, #tpu.memory_space<vmem>>, vector<512x256xf32>
    %cst_58 = arith.constant dense<0.000000e+00> : vector<8x256xf32>
    %98 = tpu.matmul %96, %97, %cst_58 {dimension_numbers = #tpu.dot_dimension_numbers<[1], [0], [0], [1], [0, 0, 1, 1], [], []>} : vector<8x512xf32>, vector<512x256xf32>, vector<8x256xf32> -> vector<8x256xf32>
    %99 = arith.negf %98 : vector<8x256xf32>
    %100 = math.exp %99 : vector<8x256xf32>
    %cst_59 = arith.constant 1.000000e+00 : f32
    %101 = vector.broadcast %cst_59 : f32 to vector<8x256xf32>
    %102 = arith.addf %101, %100 : vector<8x256xf32>
    %103 = arith.divf %101, %102 : vector<8x256xf32>
    %c0_60 = arith.constant 0 : index
    %c0_61 = arith.constant 0 : index
    %c0_62 = arith.constant 0 : index
    %104 = vector.load %arg5[%c0_60, %c0_61, %c0_62] : memref<8x32x256xf32, #tpu.memory_space<vmem>>, vector<8x32x256xf32>
    %105 = vector.shape_cast %103 : vector<8x256xf32> to vector<8x1x256xf32>
    %106 = vector.broadcast %105 : vector<8x1x256xf32> to vector<8x32x256xf32>
    %107 = arith.mulf %104, %106 : vector<8x32x256xf32>
    %c0_63 = arith.constant 0 : index
    %c0_64 = arith.constant 0 : index
    %c0_65 = arith.constant 0 : index
    %108 = vector.load %arg5[%c0_63, %c0_64, %c0_65] : memref<8x32x256xf32, #tpu.memory_space<vmem>>, vector<8x32x256xf32>
    tpu.vector_store %arg5[%c0_63, %c0_64, %c0_65], %107 {strides = array<i32>} : memref<8x32x256xf32, #tpu.memory_space<vmem>>, vector<8x32x256xf32>,
    return
  }
  func.func @transform_0(%arg0: i32) -> (i32, i32, i32) {
    %c0_i32 = arith.constant 0 : i32
    %c0_i32_0 = arith.constant 0 : i32
    %c0_i32_1 = arith.constant 0 : i32
    return %arg0, %c0_i32, %c0_i32_0 : i32, i32, i32
  }
  func.func @transform_1(%arg0: i32) -> (i32, i32) {
    %c0_i32 = arith.constant 0 : i32
    %c0_i32_0 = arith.constant 0 : i32
    %c0_i32_1 = arith.constant 0 : i32
    return %c0_i32, %c0_i32_0 : i32, i32
  }
  func.func @transform_2(%arg0: i32) -> (i32, i32) {
    %c0_i32 = arith.constant 0 : i32
    %c0_i32_0 = arith.constant 0 : i32
    %c0_i32_1 = arith.constant 0 : i32
    return %c0_i32, %c0_i32_0 : i32, i32
  }
  func.func @transform_3(%arg0: i32) -> (i32, i32) {
    %c0_i32 = arith.constant 0 : i32
    %c0_i32_0 = arith.constant 0 : i32
    %c0_i32_1 = arith.constant 0 : i32
    return %c0_i32, %c0_i32_0 : i32, i32
  }
  func.func @transform_4(%arg0: i32) -> (i32, i32, i32) {
    %c0_i32 = arith.constant 0 : i32
    %c0_i32_0 = arith.constant 0 : i32
    %c0_i32_1 = arith.constant 0 : i32
    return %arg0, %c0_i32, %c0_i32_0 : i32, i32, i32
  }
}

</mosaic_0001>

<bundles_post_ra>
// kernel: res_block_cbam.1
= control target key start
LH: loop header
LB: loop body
LE: loop exit
PB: predicated region body
PF: predicated region fallthrough
CT: control target
= control target key end

     0   :  { %s2751_s15 = smov 0   ;;  %s4396_s0 = inlined_call_operand.vmem [shape: f32[16,32,256], index: 0, kind: input, shape index: {}]   ;;  %s4397_s1 = inlined_call_operand.vmem [shape: f32[32,2], index: 1, kind: input, shape index: {}]   ;;  %s4398_s2 = inlined_call_operand.vmem [shape: f32[2,32], index: 2, kind: input, shape index: {}]   ;;  %s4399_s3 = inlined_call_operand.vmem [shape: f32[512,256], index: 3, kind: input, shape index: {}]   ;;  %s4400_s4 = inlined_call_operand.vmem [shape: f32[16,32,256], index: 4, kind: output, shape index: {}]  }
   0x1 LB: > { %s2510_s16 = sadd.s32 4294967295, %s2723_s15   ;;  %p2514_p0 = scmp.ge.s32.totalorder %s2723_s15, 1  ;;  %s2723_s15 = sphi %s2751_s15, %s14_s15  }
   0x2   : > { %p164_p1 = scmp.lt.s32.totalorder %s2723_s15, 3 }
   0x4   : > { %p165_p2 = pnand %p2514_p0, %p164_p1 }
   0x6   : > { %168 = sbr.rel (%p165_p2) target bundleno = 1243 (0x4db), region = 36 }
   0xb   : > { %s2515_s17 = sshll.u32 %s2510_s16, 3  ;;  %vm538_vm0 = vcmask 130112   ;;  %vm545_vm1 = vcmask 195712   ;;  %vm552_vm2 = vcmask 261312   ;;  %vm687_vm3 = vcmask 1041409  }
   0xc   : > { %p193_p3 = scmp.lt.s32.totalorder %s2515_s17, 15  ;;  %vm689_vm4 = vcmask 1042434   ;;  %vm691_vm5 = vcmask 1043459   ;;  %vm693_vm6 = vcmask 1044484   ;;  %vm695_vm7 = vcmask 1045509  }
   0xd   : > { %vm697_vm8 = vcmask 1046534   ;;  %vm699_vm9 = vcmask 1047559   ;;  %vm896_vm10 = vcmask 261120   ;;  %vm986_vm11 = vcmask 1041408  }
   0xe   : > { %s4526_s17 = smov (!%p193_p3, %s2515_s17), 15  ;;  %vm979_vm12 = vcmask 15360   ;;  %vm1812_vm13 = vcmask 1040384   ;;  %vm1821_vm14 = vcmask 1042432   ;;  %vm1826_vm15 = vcmask 1043456  }
   0xf   : > { %s2587_s18 = sshll.u32 %s4526_s17, 6 }
  0x10   : > { %s2767_s21 = scalar_lea.vmem %s4396_s0, %s2587_s18  ;;  %s3683_s26 = scalar_lea.vmem %s4400_s4, %s2587_s18 }
  0x11   : > { %v2770_v0 = vld [vmem:[%s2767_s21 + $0x40] sm:$0xff]  ;;  %v2773_v1 = vld [vmem:[%s2767_s21 + $0x48] sm:$0xff]  ;;  %v2784_v5 = vld [vmem:[%s2767_s21 + $0x50] sm:$0xff] }
  0x12   : > { %v2776_v2 = vld [vmem:[%s2767_s21] sm:$0xff]  ;;  %v282_v3 = vadd.f32 %v2773_v1, %v2770_v0  ;;  %v2781_v4 = vld [vmem:[%s2767_s21 + $0x8] sm:$0xff]  ;;  %v2787_v6 = vld [vmem:[%s2767_s21 + $0x58] sm:$0xff]  ;;  %v411_v52 = vmax.f32 %v2770_v0, %v2773_v1 }
  0x13   : > { %v270_v7 = vadd.f32 %v2781_v4, %v2776_v2  ;;  %v2792_v8 = vld [vmem:[%s2767_s21 + $0x10] sm:$0xff]  ;;  %v2795_v9 = vld [vmem:[%s2767_s21 + $0x18] sm:$0xff]  ;;  %v285_v10 = vadd.f32 %v2787_v6, %v2784_v5  ;;  %v2802_v12 = vld [vmem:[%s2767_s21 + $0x60] sm:$0xff]  ;;  %v399_v50 = vmax.f32 %v2776_v2, %v2781_v4  ;;  %v414_v57 = vmax.f32 %v2784_v5, %v2787_v6 }
  0x14   : > { %283 = vadd.xlane.f32.xlu1 %v282_v3  ;;  %v273_v11 = vadd.f32 %v2795_v9, %v2792_v8  ;;  %v2805_v13 = vld [vmem:[%s2767_s21 + $0x68] sm:$0xff]  ;;  %v2808_v14 = vld [vmem:[%s2767_s21 + $0x20] sm:$0xff]  ;;  %v2818_v18 = vld [vmem:[%s2767_s21 + $0x90] sm:$0xff]  ;;  %v402_v53 = vmax.f32 %v2792_v8, %v2795_v9 }
  0x15   : > { %271 = vadd.xlane.f32.xlu0 %v270_v7  ;;  %v2811_v15 = vld [vmem:[%s2767_s21 + $0x28] sm:$0xff]  ;;  %v288_v16 = vadd.f32 %v2805_v13, %v2802_v12  ;;  %v2821_v19 = vld [vmem:[%s2767_s21 + $0x98] sm:$0xff]  ;;  %v2824_v20 = vld [vmem:[%s2767_s21 + $0x80] sm:$0xff]  ;;  %v417_v5 = vmax.f32 %v2802_v12, %v2805_v13 }
  0x16   : > { %v276_v17 = vadd.f32 %v2811_v15, %v2808_v14  ;;  %v2827_v21 = vld [vmem:[%s2767_s21 + $0x88] sm:$0xff]  ;;  %v297_v22 = vadd.f32 %v2821_v19, %v2818_v18  ;;  %v2834_v24 = vld [vmem:[%s2767_s21 + $0x70] sm:$0xff]  ;;  %v2837_v25 = vld [vmem:[%s2767_s21 + $0x78] sm:$0xff]  ;;  %v405_v2 = vmax.f32 %v2808_v14, %v2811_v15  ;;  %v426_v9 = vmax.f32 %v2818_v18, %v2821_v19 }
  0x17   : > { %v294_v23 = vadd.f32 %v2827_v21, %v2824_v20  ;;  %v2840_v26 = vld [vmem:[%s2767_s21 + $0x30] sm:$0xff]  ;;  %v2843_v27 = vld [vmem:[%s2767_s21 + $0x38] sm:$0xff]  ;;  %v291_v28 = vadd.f32 %v2837_v25, %v2834_v24  ;;  %v2850_v30 = vld [vmem:[%s2767_s21 + $0xc0] sm:$0xff]  ;;  %v423_v4 = vmax.f32 %v2824_v20, %v2827_v21  ;;  %v420_v21 = vmax.f32 %v2834_v24, %v2837_v25 }
  0x18   : > { %286 = vadd.xlane.f32.xlu1 %v285_v10  ;;  %v279_v29 = vadd.f32 %v2843_v27, %v2840_v26  ;;  %v2853_v31 = vld [vmem:[%s2767_s21 + $0xc8] sm:$0xff]  ;;  %v2856_v32 = vld [vmem:[%s2767_s21 + $0xa0] sm:$0xff]  ;;  %v2866_v36 = vld [vmem:[%s2767_s21 + $0xb0] sm:$0xff]  ;;  %v408_v18 = vmax.f32 %v2840_v26, %v2843_v27 }
  0x19   : > { %274 = vadd.xlane.f32.xlu0 %v273_v11  ;;  %v2859_v33 = vld [vmem:[%s2767_s21 + $0xa8] sm:$0xff]  ;;  %v306_v34 = vadd.f32 %v2853_v31, %v2850_v30  ;;  %v2869_v37 = vld [vmem:[%s2767_s21 + $0xb8] sm:$0xff]  ;;  %v2872_v38 = vld [vmem:[%s2767_s21 + $0xd0] sm:$0xff] }
  0x1a   : > { %v300_v35 = vadd.f32 %v2859_v33, %v2856_v32  ;;  %v2875_v39 = vld [vmem:[%s2767_s21 + $0xd8] sm:$0xff]  ;;  %v303_v40 = vadd.f32 %v2869_v37, %v2866_v36  ;;  %v2882_v42 = vld [vmem:[%s2767_s21 + $0x100] sm:$0xff]  ;;  %v2885_v43 = vld [vmem:[%s2767_s21 + $0x108] sm:$0xff]  ;;  %v429_v20 = vmax.f32 %v2856_v32, %v2859_v33 }
  0x1b   : > { %v309_v41 = vadd.f32 %v2875_v39, %v2872_v38  ;;  %v2888_v44 = vld [vmem:[%s2767_s21 + $0xe0] sm:$0xff]  ;;  %v2891_v45 = vld [vmem:[%s2767_s21 + $0xe8] sm:$0xff]  ;;  %v318_v46 = vadd.f32 %v2885_v43, %v2882_v42  ;;  %v2898_v48 = vld [vmem:[%s2767_s21 + $0x110] sm:$0xff] }
  0x1c   : > { %289 = vadd.xlane.f32.xlu1 %v288_v16  ;;  %v312_v47 = vadd.f32 %v2891_v45, %v2888_v44  ;;  %v2901_v49 = vld [vmem:[%s2767_s21 + $0x118] sm:$0xff]  ;;  %v2912_v54 = vld [vmem:[%s2767_s21 + $0xf0] sm:$0xff]  ;;  %v2922_v58 = vld [vmem:[%s2767_s21 + $0x140] sm:$0xff] }
  0x1d   : > { %277 = vadd.xlane.f32.xlu0 %v276_v17  ;;  %v321_v51 = vadd.f32 %v2901_v49, %v2898_v48  ;;  %v2915_v55 = vld [vmem:[%s2767_s21 + $0xf8] sm:$0xff]  ;;  %v2925_v59 = vld [vmem:[%s2767_s21 + $0x148] sm:$0xff]  ;;  %v2928_v60 = vld [vmem:[%s2767_s21 + $0x120] sm:$0xff] }
  0x1e   : > { %v315_v56 = vadd.f32 %v2915_v55, %v2912_v54  ;;  %v2931_v61 = vld [vmem:[%s2767_s21 + $0x128] sm:$0xff]  ;;  %v330_v62 = vadd.f32 %v2925_v59, %v2922_v58  ;;  %v2938_v0 = vld [vmem:[%s2767_s21 + $0x150] sm:$0xff]  ;;  %v2941_v1 = vld [vmem:[%s2767_s21 + $0x158] sm:$0xff] }
  0x1f   : > { %v324_v63 = vadd.f32 %v2931_v61, %v2928_v60  ;;  %v333_v3 = vadd.f32 %v2941_v1, %v2938_v0  ;;  %v2952_v6 = vld [vmem:[%s2767_s21 + $0x130] sm:$0xff]  ;;  %v2955_v7 = vld [vmem:[%s2767_s21 + $0x138] sm:$0xff]  ;;  %v2962_v10 = vld [vmem:[%s2767_s21 + $0x180] sm:$0xff] }
  0x20   : > { %298 = vadd.xlane.f32.xlu1 %v297_v22  ;;  %v327_v8 = vadd.f32 %v2955_v7, %v2952_v6  ;;  %v2965_v11 = vld [vmem:[%s2767_s21 + $0x188] sm:$0xff]  ;;  %v2968_v14 = vld [vmem:[%s2767_s21 + $0x160] sm:$0xff]  ;;  %v2978_v16 = vld [vmem:[%s2767_s21 + $0x190] sm:$0xff]  ;;  %v438_v22 = vmax.f32 %v2872_v38, %v2875_v39  ;;  %v432_v39 = vmax.f32 %v2866_v36, %v2869_v37  ;;  %v453_v36 = vmax.f32 %v2928_v60, %v2931_v61 }
  0x21   : > { %295 = vadd.xlane.f32.xlu0 %v294_v23  ;;  %v2971_v12 = vld [vmem:[%s2767_s21 + $0x168] sm:$0xff]  ;;  %v342_v13 = vadd.f32 %v2965_v11, %v2962_v10  ;;  %v2981_v17 = vld [vmem:[%s2767_s21 + $0x198] sm:$0xff]  ;;  %v435_v23 = vmax.f32 %v2850_v30, %v2853_v31  ;;  %v258_v26 = vld [vmem:[%s2767_s21 + $0x1a0] sm:$0xff]  ;;  %v441_v31 = vmax.f32 %v2888_v44, %v2891_v45  ;;  %v444_v37 = vmax.f32 %v2912_v54, %v2915_v55 }
  0x22   : > { %v336_v15 = vadd.f32 %v2971_v12, %v2968_v14  ;;  %v345_v19 = vadd.f32 %v2981_v17, %v2978_v16  ;;  %v259_v27 = vld [vmem:[%s2767_s21 + $0x1a8] sm:$0xff]  ;;  %v265_v24 = vld [vmem:[%s2767_s21 + $0x1d8] sm:$0xff]  ;;  %v262_v25 = vld [vmem:[%s2767_s21 + $0x1c0] sm:$0xff]  ;;  %v471_v54 = vmax.f32 %v2962_v10, %v2965_v11  ;;  %v465_v55 = vmax.f32 %v2968_v14, %v2971_v12 }
  0x23   : > { %v348_v32 = vadd.f32 %v259_v27, %v258_v26 }
  0x24   : > { %292 = vadd.xlane.f32.xlu1 %v291_v28  ;;  %v252_v28 = vld [vmem:[%s2767_s21 + $0x170] sm:$0xff] }
  0x25   : > { %280 = vadd.xlane.f32.xlu0 %v279_v29  ;;  %v253_v29 = vld [vmem:[%s2767_s21 + $0x178] sm:$0xff] }
  0x26   : > { %v339_v33 = vadd.f32 %v253_v29, %v252_v28 }
  0x28   : > { %307 = vadd.xlane.f32.xlu1 %v306_v34  ;;  %v264_v34 = vld [vmem:[%s2767_s21 + $0x1d0] sm:$0xff] }
  0x29   : > { %301 = vadd.xlane.f32.xlu0 %v300_v35  ;;  %v263_v35 = vld [vmem:[%s2767_s21 + $0x1c8] sm:$0xff]  ;;  %v357_v38 = vadd.f32 %v265_v24, %v264_v34  ;;  %v486_v61 = vmax.f32 %v264_v34, %v265_v24 }
  0x2a   : > { %v354_v30 = vadd.f32 %v263_v35, %v262_v25 }
  0x2c   : > { %304 = vadd.xlane.f32.xlu1 %v303_v40  ;;  %v450_v40 = vmax.f32 %v2898_v48, %v2901_v49  ;;  %v268_v48 = vld [vmem:[%s2767_s21 + $0x1f0] sm:$0xff]  ;;  %v269_v49 = vld [vmem:[%s2767_s21 + $0x1f8] sm:$0xff] }
  0x2d   : > { %310 = vadd.xlane.f32.xlu0 %v309_v41  ;;  %v447_v41 = vmax.f32 %v2882_v42, %v2885_v43  ;;  %v462_v42 = vmax.f32 %v2938_v0, %v2941_v1  ;;  %v459_v43 = vmax.f32 %v2922_v58, %v2925_v59  ;;  %v483_v58 = vmax.f32 %v262_v25, %v263_v35  ;;  %v895_v1 = vld [vmem:[%s4397_s1 + $0x18] sm:$0xff] }
  0x2e   : > { %v477_v59 = vmax.f32 %v258_v26, %v259_v27  ;;  %v527_v0 = vlaneseq  ;;  %2598 = vmatprep.subr.mxu0 %v895_v1 }
  0x2f   : > { %2599 = vmatpush3.msra.mxu0 %v895_v1 }
  0x30   : > { %319 = vadd.xlane.f32.xlu1 %v318_v46  ;;  %v266_v46 = vld [vmem:[%s2767_s21 + $0x1e0] sm:$0xff] }
  0x31   : > { %313 = vadd.xlane.f32.xlu0 %v312_v47  ;;  %v267_v47 = vld [vmem:[%s2767_s21 + $0x1e8] sm:$0xff] }
  0x32   : > { %v360_v44 = vadd.f32 %v267_v47, %v266_v46 }
  0x34   : > { %400 = vmax.xlane.f32.xlu1 %v399_v50  ;;  %v260_v50 = vld [vmem:[%s2767_s21 + $0x1b0] sm:$0xff] }
  0x35   : > { %322 = vadd.xlane.f32.xlu0 %v321_v51  ;;  %v261_v51 = vld [vmem:[%s2767_s21 + $0x1b8] sm:$0xff] }
  0x36   : > { %v351_v45 = vadd.f32 %v261_v51, %v260_v50  ;;  %v480_v60 = vmax.f32 %v260_v50, %v261_v51 }
  0x38   : > { %412 = vmax.xlane.f32.xlu1 %v411_v52  ;;  %v456_v52 = vmax.f32 %v2952_v6, %v2955_v7 }
  0x39   : > { %403 = vmax.xlane.f32.xlu0 %v402_v53  ;;  %v363_v53 = vadd.f32 %v269_v49, %v268_v48 }
  0x3c   : > { %316 = vadd.xlane.f32.xlu1 %v315_v56  ;;  %v468_v56 = vmax.f32 %v252_v28, %v253_v29 }
  0x3d   : > { %415 = vmax.xlane.f32.xlu0 %v414_v57  ;;  %v474_v57 = vmax.f32 %v2978_v16, %v2981_v17 }
  0x40   : > { %331 = vadd.xlane.f32.xlu1 %v330_v62  ;;  %v492_v62 = vmax.f32 %v268_v48, %v269_v49 }
  0x41   : > { %325 = vadd.xlane.f32.xlu0 %v324_v63  ;;  %v489_v63 = vmax.f32 %v266_v46, %v267_v47 }
  0x44   : > { %406 = vmax.xlane.f32.xlu1 %v405_v2  ;;  %v894_v2 = vld [vmem:[%s4397_s1 + $0x10] sm:$0xff] }
  0x45   : > { %334 = vadd.xlane.f32.xlu0 %v333_v3  ;;  %v528_v3 = vand.u32 127, %v527_v0  ;;  %2600 = vmatprep.subr.mxu0 %v894_v2 }
  0x46   : > { %2601 = vmatpush3.msra.mxu0 %v894_v2 }
  0x47   : > { %v533_v6 = vadd.s32 4294967288, %v528_v3  ;;  %v540_v12 = vadd.s32 4294967280, %v528_v3  ;;  %v547_v24 = vadd.s32 4294967272, %v528_v3 }
  0x48   : > { %424 = vmax.xlane.f32.xlu1 %v423_v4  ;;  %v893_v4 = vld [vmem:[%s4397_s1 + $0x8] sm:$0xff] }
  0x49   : > { %418 = vmax.xlane.f32.xlu0 %v417_v5  ;;  %v3042_v5 = vshrl.u32 %v527_v0, 7  ;;  %2602 = vmatprep.subr.mxu0 %v893_v4 }
  0x4a   : > { %2603 = vmatpush3.msra.mxu0 %v893_v4 }
  0x4b   : > { %4440 = vst [vmem:[#allocation2_spill] sm:$0xff] %v3042_v5  ;;  %v3048_v10 = vsub.s32 %v528_v3, %v3042_v5  ;;  %v3051_v14 = vsub.s32 %v533_v6, %v3042_v5  ;;  %v3068_v46 = vsub.s32 %v547_v24, %v3042_v5 }
  0x4c   : > { %328 = vadd.xlane.f32.xlu1 %v327_v8  ;;  %v892_v8 = vld [vmem:[%s4397_s1] sm:$0xff] }
  0x4d   : > { %427 = vmax.xlane.f32.xlu0 %v426_v9  ;;  %2604 = vmatprep.subr.mxu0 %v892_v8 }
  0x4e   : > { %2605 = vmatpush3.msra.mxu0 %v892_v8 }
  0x50   : > { %343 = vadd.xlane.f32.xlu1 %v342_v13 }
  0x51   : > { %337 = vadd.xlane.f32.xlu0 %v336_v15 }
  0x54   : > { %409 = vmax.xlane.f32.xlu1 %v408_v18 }
  0x55   : > { %346 = vadd.xlane.f32.xlu0 %v345_v19 }
  0x58   : > { %430 = vmax.xlane.f32.xlu1 %v429_v20 }
  0x59   : > { %421 = vmax.xlane.f32.xlu0 %v420_v21  ;;  %v3056_v21 = vsub.s32 %v540_v12, %v3042_v5 }
  0x5c   : > { %439 = vmax.xlane.f32.xlu1 %v438_v22 }
  0x5d   : > { %436 = vmax.xlane.f32.xlu0 %v435_v23 }
  0x60   : > { %349 = vadd.xlane.f32.xlu1 %v348_v32 }
  0x61   : > { %340 = vadd.xlane.f32.xlu0 %v339_v33 }
  0x64   : > { %358 = vadd.xlane.f32.xlu1 %v357_v38 }
  0x65   : > { %355 = vadd.xlane.f32.xlu0 %v354_v30 }
  0x68   : > { %442 = vmax.xlane.f32.xlu1 %v441_v31 }
  0x69   : > { %433 = vmax.xlane.f32.xlu0 %v432_v39 }
  0x6c   : > { %451 = vmax.xlane.f32.xlu1 %v450_v40 }
  0x6d   : > { %448 = vmax.xlane.f32.xlu0 %v447_v41 }
  0x70   : > { %361 = vadd.xlane.f32.xlu1 %v360_v44 }
  0x71   : > { %352 = vadd.xlane.f32.xlu0 %v351_v45 }
  0x74   : > { %454 = vmax.xlane.f32.xlu1 %v453_v36 }
  0x75   : > { %445 = vmax.xlane.f32.xlu0 %v444_v37 }
  0x78   : > { %463 = vmax.xlane.f32.xlu1 %v462_v42 }
  0x79   : > { %460 = vmax.xlane.f32.xlu0 %v459_v43 }
  0x7c   : > { %457 = vmax.xlane.f32.xlu1 %v456_v52 }
  0x7d   : > { %364 = vadd.xlane.f32.xlu0 %v363_v53 }
  0x80   : > { %472 = vmax.xlane.f32.xlu1 %v471_v54 }
  0x81   : > { %466 = vmax.xlane.f32.xlu0 %v465_v55 }
  0x84   : > { %469 = vmax.xlane.f32.xlu1 %v468_v56 }
  0x85   : > { %475 = vmax.xlane.f32.xlu0 %v474_v57 }
  0x88   : > { %484 = vmax.xlane.f32.xlu1 %v483_v58 }
  0x89   : > { %478 = vmax.xlane.f32.xlu0 %v477_v59 }
  0x8c   : > { %481 = vmax.xlane.f32.xlu1 %v480_v60 }
  0x8d   : > { %487 = vmax.xlane.f32.xlu0 %v486_v61 }
  0x90   : > { %493 = vmax.xlane.f32.xlu1 %v492_v62 }
  0x91   : > { %490 = vmax.xlane.f32.xlu0 %v489_v63 }
  0x9d   : > { %v284_v7 = vpop.xlane.xlu1 %283 }
  0x9e   : > { %v272_v9 = vpop.xlane.xlu0 %271  ;;  %v371_v11 = vmul.f32 0.00390625, %v284_v7 }
  0x9f   : > { %v367_v13 = vmul.f32 0.00390625, %v272_v9 }
  0xa0   : > { %v557_v19 = vrot.slane %v371_v11, %v3048_v10 }
  0xa1   : > { %v287_v15 = vpop.xlane.xlu1 %286  ;;  %v532_v22 = vrot.slane %v367_v13, %v3048_v10 }
  0xa2   : > { %v372_v16 = vmul.f32 0.00390625, %v287_v15  ;;  %v275_v17 = vpop.xlane.xlu0 %274 }
  0xa3   : > { %v368_v18 = vmul.f32 0.00390625, %v275_v17 }
  0xa4   : > { %v561_v20 = vrot.slane %v372_v16, %v3051_v14 }
  0xa5   : > { %v537_v23 = vrot.slane %v368_v18, %v3051_v14  ;;  %v290_v26 = vpop.xlane.xlu1 %289 }
  0xa6   : > { %v562_v27 = vsel %vm538_vm0, %v561_v20, %v557_v19  ;;  %v373_v28 = vmul.f32 0.00390625, %v290_v26  ;;  %v278_v29 = vpop.xlane.xlu0 %277 }
  0xa7   : > { %v539_v32 = vsel %vm538_vm0, %v537_v23, %v532_v22  ;;  %v369_v33 = vmul.f32 0.00390625, %v278_v29 }
  0xa8   : > { %v566_v34 = vrot.slane %v373_v28, %v3056_v21 }
  0xa9   : > { %v544_v25 = vrot.slane %v369_v33, %v3056_v21  ;;  %v299_v35 = vpop.xlane.xlu1 %298 }
  0xaa   : > { %v567_v38 = vsel %vm545_vm1, %v566_v34, %v562_v27  ;;  %v376_v30 = vmul.f32 0.00390625, %v299_v35  ;;  %v296_v31 = vpop.xlane.xlu0 %295 }
  0xab   : > { %v546_v39 = vsel %vm545_vm1, %v544_v25, %v539_v32  ;;  %v375_v40 = vmul.f32 0.00390625, %v296_v31 }
  0xac   : > { %v580_v41 = vrot.slane %v376_v30, %v3051_v14 }
  0xad   : > { %v576_v47 = vrot.slane %v375_v40, %v3048_v10  ;;  %v293_v50 = vpop.xlane.xlu1 %292 }
  0xae   : > { %v374_v51 = vmul.f32 0.00390625, %v293_v50  ;;  %v281_v44 = vpop.xlane.xlu0 %280 }
  0xaf   : > { %v581_v45 = vsel %vm538_vm0, %v580_v41, %v576_v47  ;;  %v370_v36 = vmul.f32 0.00390625, %v281_v44 }
  0xb0   : > { %v571_v37 = vrot.slane %v374_v51, %v3068_v46 }
  0xb1   : > { %v551_v42 = vrot.slane %v370_v36, %v3068_v46  ;;  %v308_v43 = vpop.xlane.xlu1 %307 }
  0xb2   : > { %v572_v48 = vsel %vm552_vm2, %v571_v37, %v567_v38  ;;  %v302_v49 = vpop.xlane.xlu0 %301  ;;  %v379_v55 = vmul.f32 0.00390625, %v308_v43 }
  0xb3   : > { %v553_v52 = vsel %vm552_vm2, %v551_v42, %v546_v39  ;;  %v377_v53 = vmul.f32 0.00390625, %v302_v49 }
  0xb4   : > { %v688_v54 = vsel %vm687_vm3, %v572_v48, %v553_v52  ;;  %v595_v63 = vrot.slane %v379_v55, %v3048_v10 }
  0xb5   : > { %v585_v56 = vrot.slane %v377_v53, %v3056_v21  ;;  %v305_v57 = vpop.xlane.xlu1 %304 }
  0xb6   : > { %v378_v58 = vmul.f32 0.00390625, %v305_v57  ;;  %v311_v59 = vpop.xlane.xlu0 %310 }
  0xb7   : > { %v586_v60 = vsel %vm545_vm1, %v585_v56, %v581_v45  ;;  %v380_v61 = vmul.f32 0.00390625, %v311_v59 }
  0xb8   : > { %v590_v62 = vrot.slane %v378_v58, %v3068_v46 }
  0xb9   : > { %v599_v0 = vrot.slane %v380_v61, %v3051_v14  ;;  %v320_v1 = vpop.xlane.xlu1 %319 }
  0xba   : > { %v591_v2 = vsel %vm552_vm2, %v590_v62, %v586_v60  ;;  %v314_v3 = vpop.xlane.xlu0 %313  ;;  %v383_v8 = vmul.f32 0.00390625, %v320_v1 }
  0xbb   : > { %v690_v4 = vsel %vm689_vm4, %v591_v2, %v688_v54  ;;  %v600_v6 = vsel %vm538_vm0, %v599_v0, %v595_v63  ;;  %v381_v7 = vmul.f32 0.00390625, %v314_v3 }
  0xbc   : > { %v614_v16 = vrot.slane %v383_v8, %v3048_v10 }
  0xbd   : > { %v604_v9 = vrot.slane %v381_v7, %v3056_v21  ;;  %v401_v11 = vpop.xlane.xlu1 %400 }
  0xbe   : > { %v323_v12 = vpop.xlane.xlu0 %322  ;;  %v736_v20 = vrot.slane %v401_v11, %v3048_v10 }
  0xbf   : > { %v605_v13 = vsel %vm545_vm1, %v604_v9, %v600_v6  ;;  %v384_v15 = vmul.f32 0.00390625, %v323_v12 }
  0xc1   : > { %v618_v17 = vrot.slane %v384_v15, %v3051_v14  ;;  %v413_v18 = vpop.xlane.xlu1 %412 }
  0xc2   : > { %v404_v19 = vpop.xlane.xlu0 %403  ;;  %v755_v32 = vrot.slane %v413_v18, %v3048_v10 }
  0xc3   : > { %v619_v22 = vsel %vm538_vm0, %v618_v17, %v614_v16  ;;  %v740_v23 = vrot.slane %v404_v19, %v3051_v14 }
  0xc5   : > { %v741_v26 = vsel %vm538_vm0, %v740_v23, %v736_v20  ;;  %v317_v27 = vpop.xlane.xlu1 %316 }
  0xc6   : > { %v382_v28 = vmul.f32 0.00390625, %v317_v27  ;;  %v416_v29 = vpop.xlane.xlu0 %415 }
  0xc7   : > { %v759_v33 = vrot.slane %v416_v29, %v3051_v14 }
  0xc8   : > { %v609_v34 = vrot.slane %v382_v28, %v3068_v46 }
  0xc9   : > { %v760_v24 = vsel %vm538_vm0, %v759_v33, %v755_v32  ;;  %v332_v25 = vpop.xlane.xlu1 %331 }
  0xca   : > { %v610_v35 = vsel %vm552_vm2, %v609_v34, %v605_v13  ;;  %v326_v38 = vpop.xlane.xlu0 %325  ;;  %v387_v34 = vmul.f32 0.00390625, %v332_v25 }
  0xcb   : > { %v692_v30 = vsel %vm691_vm5, %v610_v35, %v690_v4  ;;  %v385_v47 = vmul.f32 0.00390625, %v326_v38 }
  0xcd   : > { %v407_v31 = vpop.xlane.xlu1 %406  ;;  %v623_v45 = vrot.slane %v385_v47, %v3056_v21 }
  0xce   : > { %v745_v39 = vrot.slane %v407_v31, %v3056_v21  ;;  %v335_v40 = vpop.xlane.xlu0 %334 }
  0xcf   : > { %v624_v49 = vsel %vm545_vm1, %v623_v45, %v619_v22  ;;  %v388_v27 = vmul.f32 0.00390625, %v335_v40  ;;  %v633_v45 = vrot.slane %v387_v34, %v3048_v10 }
  0xd0   : > { %v746_v41 = vsel %vm545_vm1, %v745_v39, %v741_v26 }
  0xd1   : > { %v425_v50 = vpop.xlane.xlu1 %424  ;;  %v637_v31 = vrot.slane %v388_v27, %v3051_v14 }
  0xd2   : > { %v419_v51 = vpop.xlane.xlu0 %418  ;;  %v774_v11 = vrot.slane %v425_v50, %v3048_v10 }
  0xd3   : > { %v764_v44 = vrot.slane %v419_v51, %v3056_v21 }
  0xd5   : > { %v765_v36 = vsel %vm545_vm1, %v764_v44, %v760_v24  ;;  %v329_v37 = vpop.xlane.xlu1 %328 }
  0xd6   : > { %v386_v42 = vmul.f32 0.00390625, %v329_v37  ;;  %v428_v43 = vpop.xlane.xlu0 %427 }
  0xd7   : > { %v778_v8 = vrot.slane %v428_v43, %v3051_v14  ;;  %v638_v43 = vsel %vm538_vm0, %v637_v31, %v633_v45 }
  0xd8   : > { %v628_v48 = vrot.slane %v386_v42, %v3068_v46 }
  0xd9   : > { %v344_v52 = vpop.xlane.xlu1 %343  ;;  %v779_v15 = vsel %vm538_vm0, %v778_v8, %v774_v11 }
  0xda   : > { %v629_v53 = vsel %vm552_vm2, %v628_v48, %v624_v49  ;;  %v338_v54 = vpop.xlane.xlu0 %337  ;;  %v391_v38 = vmul.f32 0.00390625, %v344_v52 }
  0xdb   : > { %v3108_v55 = vsel %vm693_vm6, %v629_v53, %v692_v30  ;;  %v389_v29 = vmul.f32 0.00390625, %v338_v54 }
  0xdc   : > { %v652_v37 = vrot.slane %v391_v38, %v3048_v10 }
  0xdd   : > { %v410_v56 = vpop.xlane.xlu1 %409  ;;  %v642_v50 = vrot.slane %v389_v29, %v3056_v21 }
  0xde   : > { %v347_v57 = vpop.xlane.xlu0 %346  ;;  %v750_v58 = vrot.slane %v410_v56, %v3068_v46 }
  0xdf   : > { %v392_v32 = vmul.f32 0.00390625, %v347_v57  ;;  %v643_v53 = vsel %vm545_vm1, %v642_v50, %v638_v43 }
  0xe0   : > { %v751_v62 = vsel %vm552_vm2, %v750_v58, %v746_v41 }
  0xe1   : > { %v431_v59 = vpop.xlane.xlu1 %430  ;;  %v656_v40 = vrot.slane %v392_v32, %v3051_v14 }
  0xe2   : > { %v422_v60 = vpop.xlane.xlu0 %421  ;;  %v783_v9 = vrot.slane %v431_v59, %v3056_v21 }
  0xe3   : > { %v769_v61 = vrot.slane %v422_v60, %v3068_v46  ;;  %v657_v54 = vsel %vm538_vm0, %v656_v40, %v652_v37 }
  0xe4   : > { %v784_v17 = vsel %vm545_vm1, %v783_v9, %v779_v15 }
  0xe5   : > { %v770_v63 = vsel %vm552_vm2, %v769_v61, %v765_v36  ;;  %v3114_v0 = vpop.xlane.xlu1 %439 }
  0xe6   : > { %v885_v1 = vsel %vm687_vm3, %v770_v63, %v751_v62  ;;  %v3117_v2 = vpop.xlane.xlu0 %436 }
  0xe9   : > { %v350_v3 = vpop.xlane.xlu1 %349 }
  0xea   : > { %v341_v4 = vpop.xlane.xlu0 %340  ;;  %v393_v24 = vmul.f32 0.00390625, %v350_v3 }
  0xeb   : > { %v390_v35 = vmul.f32 0.00390625, %v341_v4 }
  0xec   : > { %v661_v25 = vrot.slane %v393_v24, %v3056_v21 }
  0xed   : > { %v359_v6 = vpop.xlane.xlu1 %358  ;;  %v647_v36 = vrot.slane %v390_v35, %v3068_v46 }
  0xee   : > { %v356_v7 = vpop.xlane.xlu0 %355  ;;  %v396_v39 = vmul.f32 0.00390625, %v359_v6  ;;  %v662_v58 = vsel %vm545_vm1, %v661_v25, %v657_v54 }
  0xef   : > { %v395_v41 = vmul.f32 0.00390625, %v356_v7  ;;  %v648_v59 = vsel %vm552_vm2, %v647_v36, %v643_v53 }
  0xf0   : > { %v675_v48 = vrot.slane %v396_v39, %v3051_v14  ;;  %v696_v6 = vsel %vm695_vm7, %v648_v59, %v3108_v55 }
  0xf1   : > { %v3122_v12 = vpop.xlane.xlu1 %442  ;;  %v671_v49 = vrot.slane %v395_v41, %v3048_v10 }
  0xf2   : > { %v434_v13 = vpop.xlane.xlu0 %433  ;;  %v802_v55 = vrot.slane %v3122_v12, %v3056_v21 }
  0xf3   : > { %v788_v16 = vrot.slane %v434_v13, %v3068_v46  ;;  %v676_v62 = vsel %vm538_vm0, %v675_v48, %v671_v49 }
  0xf5   : > { %v789_v18 = vsel %vm552_vm2, %v788_v16, %v784_v17  ;;  %v3128_v19 = vpop.xlane.xlu1 %451  ;;  %v797_v16 = vrot.slane %v3114_v0, %v3051_v14  ;;  %v793_v17 = vrot.slane %v3117_v2, %v3048_v10 }
  0xf6   : > { %v3131_v20 = vsel %vm689_vm4, %v789_v18, %v885_v1  ;;  %v3133_v22 = vpop.xlane.xlu0 %448 }
  0xf9   : > { %v362_v23 = vpop.xlane.xlu1 %361 }
  0xfa   : > { %v353_v26 = vpop.xlane.xlu0 %352  ;;  %v397_v51 = vmul.f32 0.00390625, %v362_v23  ;;  %v816_v23 = vrot.slane %v3128_v19, %v3051_v14 }
  0xfb   : > { %v394_v30 = vmul.f32 0.00390625, %v353_v26  ;;  %v812_v26 = vrot.slane %v3133_v22, %v3048_v10  ;;  %v798_v22 = vsel %vm538_vm0, %v797_v16, %v793_v17  ;;  %v1131_v16 = vsub.s32 3, %v3042_v5  ;;  %v1877_v17 = vld [vmem:[%s4399_s3 + $0xf8] sm:$0xff] }
  0xfc   : > { %v680_v56 = vrot.slane %v397_v51, %v3056_v21 }
  0xfd   : > { %v3135_v28 = vpop.xlane.xlu1 %454  ;;  %v666_v42 = vrot.slane %v394_v30, %v3068_v46  ;;  %v817_v38 = vsel %vm538_vm0, %v816_v23, %v812_v26  ;;  %v1150_v23 = vsub.s32 4, %v3042_v5  ;;  %v1876_v26 = vld [vmem:[%s4399_s3 + $0xf0] sm:$0xff] }
  0xfe   : > { %v3137_v33 = vpop.xlane.xlu0 %445  ;;  %v681_v4 = vsel %vm545_vm1, %v680_v56, %v676_v62  ;;  %v821_v27 = vrot.slane %v3135_v28, %v3056_v21 }
  0xff   : > { %v667_v61 = vsel %vm552_vm2, %v666_v42, %v662_v58  ;;  %v807_v29 = vrot.slane %v3137_v33, %v3068_v46  ;;  %v803_v33 = vsel %vm545_vm1, %v802_v55, %v798_v22  ;;  %v1872_v22 = vld [vmem:[%s4399_s3 + $0xd0] sm:$0xff] }
 0x100   : > { %v698_v8 = vsel %vm697_vm8, %v667_v61, %v696_v6  ;;  %v822_v39 = vsel %vm545_vm1, %v821_v27, %v817_v38  ;;  %v3223_v6 = vsub.s32 1, %v3042_v5  ;;  %v1940_v27 = vld [vmem:[%s4399_s3 + $0x2f0] sm:$0xff]  ;;  %v1934_v38 = vld [vmem:[%s4399_s3 + $0x2c0] sm:$0xff] }
 0x101   : > { %v3140_v47 = vpop.xlane.xlu1 %463  ;;  %v808_v41 = vsel %vm552_vm2, %v807_v29, %v803_v33  ;;  %v1875_v29 = vld [vmem:[%s4399_s3 + $0xe8] sm:$0xff]  ;;  %v1870_v33 = vld [vmem:[%s4399_s3 + $0xc0] sm:$0xff] }
 0x102   : > { %v461_v44 = vpop.xlane.xlu0 %460  ;;  %v835_v0 = vrot.slane %v3140_v47, %v3051_v14  ;;  %v887_v48 = vsel %vm691_vm5, %v808_v41, %v3131_v20  ;;  %4441 = vst [vmem:[#allocation3_spill] sm:$0xff] %v3223_v6  ;;  %v1932_v41 = vld [vmem:[%s4399_s3 + $0x2b0] sm:$0xff] }
 0x103   : > { %v831_v2 = vrot.slane %v461_v44, %v3048_v10 }
 0x105   : > { %v458_v52 = vpop.xlane.xlu1 %457  ;;  %v836_v47 = vsel %vm538_vm0, %v835_v0, %v831_v2  ;;  %v1939_v0 = vld [vmem:[%s4399_s3 + $0x2e8] sm:$0xff]  ;;  %v1874_v2 = vld [vmem:[%s4399_s3 + $0xe0] sm:$0xff] }
 0x106   : > { %v365_v57 = vpop.xlane.xlu0 %364  ;;  %v826_v32 = vrot.slane %v458_v52, %v3068_v46 }
 0x107   : > { %v398_v60 = vmul.f32 0.00390625, %v365_v57 }
 0x108   : > { %v827_v40 = vsel %vm552_vm2, %v826_v32, %v822_v39  ;;  %v1938_v32 = vld [vmem:[%s4399_s3 + $0x2e0] sm:$0xff]  ;;  %v1868_v39 = vld [vmem:[%s4399_s3 + $0xb0] sm:$0xff] }
 0x109   : > { %v685_v63 = vrot.slane %v398_v60, %v3068_v46  ;;  %v473_v1 = vpop.xlane.xlu1 %472  ;;  %v888_v52 = vsel %vm693_vm6, %v827_v40, %v887_v48  ;;  %v1169_v40 = vsub.s32 5, %v3042_v5  ;;  %v1927_v48 = vld [vmem:[%s4399_s3 + $0x288] sm:$0xff] }
 0x10a   : > { %v467_v3 = vpop.xlane.xlu0 %466  ;;  %v850_v30 = vrot.slane %v473_v1, %v3048_v10 }
 0x10b   : > { %v686_v7 = vsel %vm552_vm2, %v685_v63, %v681_v4  ;;  %v840_v12 = vrot.slane %v467_v3, %v3056_v21 }
 0x10c   : > { %v700_v9 = vsel %vm699_vm9, %v686_v7, %v698_v8 }
 0x10d   : > { %2606 = vmatprep.mubr.msk.f32.mxu0 %vm896_vm10, %v700_v9  ;;  %v470_v11 = vpop.xlane.xlu1 %469  ;;  %v841_v51 = vsel %vm545_vm1, %v840_v12, %v836_v47  ;;  %v1112_v9 = vsub.s32 2, %v3042_v5  ;;  %v1873_v12 = vld [vmem:[%s4399_s3 + $0xd8] sm:$0xff]  ;;  %v1867_v47 = vld [vmem:[%s4399_s3 + $0xa8] sm:$0xff] }
 0x10e   : > { %v476_v13 = vpop.xlane.xlu0 %475  ;;  %v845_v24 = vrot.slane %v470_v11, %v3068_v46  ;;  %v3233_v11 = vsub.s32 0, %v3042_v5 }
 0x10f   : > { %v854_v19 = vrot.slane %v476_v13, %v3051_v14 }
 0x110   : > { %v846_v25 = vsel %vm552_vm2, %v845_v24, %v841_v51  ;;  %4442 = vst [vmem:[#allocation4_spill] sm:$0xff] %v3233_v11  ;;  %v1936_v24 = vld [vmem:[%s4399_s3 + $0x2d0] sm:$0xff]  ;;  %v1866_v51 = vld [vmem:[%s4399_s3 + $0xa0] sm:$0xff] }
 0x111   : > { %v485_v15 = vpop.xlane.xlu1 %484  ;;  %v855_v44 = vsel %vm538_vm0, %v854_v19, %v850_v30  ;;  %v889_v54 = vsel %vm695_vm7, %v846_v25, %v888_v52  ;;  %v1937_v19 = vld [vmem:[%s4399_s3 + $0x2d8] sm:$0xff] }
 0x112   : > { %v479_v18 = vpop.xlane.xlu0 %478  ;;  %v869_v36 = vrot.slane %v485_v15, %v3048_v10  ;;  %v1869_v30 = vld [vmem:[%s4399_s3 + $0xb8] sm:$0xff] }
 0x113   : > { %v859_v28 = vrot.slane %v479_v18, %v3056_v21  ;;  %v1941_v18 = vld [vmem:[%s4399_s3 + $0x2f8] sm:$0xff] }
 0x114   : > { %2045 = vmatprep.subr.mxu0 %v1941_v18  ;;  %v1929_v25 = vld [vmem:[%s4399_s3 + $0x298] sm:$0xff] }
 0x115   : > { %v482_v34 = vpop.xlane.xlu1 %481  ;;  %v860_v37 = vsel %vm545_vm1, %v859_v28, %v855_v44  ;;  %v1871_v28 = vld [vmem:[%s4399_s3 + $0xc8] sm:$0xff]  ;;  %v1930_v44 = vld [vmem:[%s4399_s3 + $0x2a0] sm:$0xff]  ;;  %v1861_v52 = vld [vmem:[%s4399_s3 + $0x78] sm:$0xff] }
 0x116   : > { %v488_v35 = vpop.xlane.xlu0 %487  ;;  %v864_v31 = vrot.slane %v482_v34, %v3068_v46 }
 0x117   : > { %v873_v50 = vrot.slane %v488_v35, %v3051_v14  ;;  %v1935_v35 = vld [vmem:[%s4399_s3 + $0x2c8] sm:$0xff] }
 0x118   : > { %v865_v14 = vsel %vm552_vm2, %v864_v31, %v860_v37  ;;  %v1933_v31 = vld [vmem:[%s4399_s3 + $0x2b8] sm:$0xff]  ;;  %v1928_v37 = vld [vmem:[%s4399_s3 + $0x290] sm:$0xff] }
 0x119   : > { %v494_v45 = vpop.xlane.xlu1 %493  ;;  %v874_v53 = vsel %vm538_vm0, %v873_v50, %v869_v36  ;;  %v890_v57 = vsel %vm697_vm8, %v865_v14, %v889_v54  ;;  %v1931_v50 = vld [vmem:[%s4399_s3 + $0x2a8] sm:$0xff]  ;;  %v1864_v36 = vld [vmem:[%s4399_s3 + $0x90] sm:$0xff]  ;;  %v1862_v14 = vld [vmem:[%s4399_s3 + $0x80] sm:$0xff]  ;;  %v1188_v54 = vsub.s32 6, %v3042_v5  ;;  %vm1831_vm0 = vcmask 1044480  }
 0x11a   : > { %v491_v42 = vpop.xlane.xlu0 %490  ;;  %v883_v43 = vrot.slane %v494_v45, %v3068_v46  ;;  %v1865_v45 = vld [vmem:[%s4399_s3 + $0x98] sm:$0xff] }
 0x11b   : > { %v878_v49 = vrot.slane %v491_v42, %v3056_v21  ;;  %v978_v21 = vld [vmem:[%s4398_s2] sm:$0x3] }
 0x11c   : > { %2609 = vmatprep.subr.msk.mxu1 %vm986_vm11, %v978_v21 }
 0x11d   : > { %v879_v10 = vsel %vm545_vm1, %v878_v49, %v874_v53  ;;  %2610 = vmatpush3.msk.msra.mxu1 %vm986_vm11, %v978_v21  ;;  %v1926_v49 = vld [vmem:[%s4399_s3 + $0x280] sm:$0xff]  ;;  %v1925_v53 = vld [vmem:[%s4399_s3 + $0x278] sm:$0xff]  ;;  %vm1836_vm1 = vcmask 1045504  }
 0x11e   : > { %v884_v56 = vsel %vm552_vm2, %v883_v43, %v879_v10  ;;  %1974 = vmatprep.subr.mxu1 %v1877_v17  ;;  %v1863_v43 = vld [vmem:[%s4399_s3 + $0x88] sm:$0xff]  ;;  %v1860_v10 = vld [vmem:[%s4399_s3 + $0x70] sm:$0xff]  ;;  %v1858_v21 = vld [vmem:[%s4399_s3 + $0x60] sm:$0xff]  ;;  %vm1841_vm2 = vcmask 1046528  }
 0x11f   : > { %v891_v46 = vsel %vm699_vm9, %v884_v56, %v890_v57  ;;  %v1924_v56 = vld [vmem:[%s4399_s3 + $0x270] sm:$0xff]  ;;  %v1859_v57 = vld [vmem:[%s4399_s3 + $0x68] sm:$0xff] }
 0x120   : > { %2607 = vmatmul.mubr.msk.f32.vlgmr.msra.gmra.mxu0 %vm896_vm10, %v891_v46  ;;  %v1923_v46 = vld [vmem:[%s4399_s3 + $0x268] sm:$0xff]  ;;  %v1916_v17 = vld [vmem:[%s4399_s3 + $0x230] sm:$0xff] }
 0x121   : > { %2046 = vmatpush1.msra.mxu0 %v1940_v27  ;;  %v1849_v27 = vld [vmem:[%s4399_s3 + $0x18] sm:$0xff] }
 0x122   : > { %2047 = vmatprep.subr.mxu0 %v1939_v0  ;;  %v1848_v0 = vld [vmem:[%s4399_s3 + $0x10] sm:$0xff] }
 0x123   : > { %2048 = vmatpush1.msra.mxu0 %v1938_v32  ;;  %v1911_v32 = vld [vmem:[%s4399_s3 + $0x208] sm:$0xff] }
 0x124   : > { %2049 = vmatprep.subr.mxu0 %v1937_v19  ;;  %v1910_v19 = vld [vmem:[%s4399_s3 + $0x200] sm:$0xff] }
 0x125   : > { %2050 = vmatpush1.msra.mxu0 %v1936_v24  ;;  %v1908_v24 = vld [vmem:[%s4399_s3 + $0x1f0] sm:$0xff] }
 0x126   : > { %2051 = vmatprep.subr.mxu0 %v1935_v35  ;;  %v1907_v35 = vld [vmem:[%s4399_s3 + $0x1e8] sm:$0xff] }
 0x127   : > { %2052 = vmatpush1.msra.mxu0 %v1934_v38  ;;  %v1906_v38 = vld [vmem:[%s4399_s3 + $0x1e0] sm:$0xff] }
 0x128   : > { %2053 = vmatprep.subr.mxu0 %v1933_v31  ;;  %v1905_v31 = vld [vmem:[%s4399_s3 + $0x1d8] sm:$0xff] }
 0x129   : > { %2054 = vmatpush1.msra.mxu0 %v1932_v41  ;;  %v1904_v41 = vld [vmem:[%s4399_s3 + $0x1d0] sm:$0xff] }
 0x12a   : > { %2055 = vmatprep.subr.mxu0 %v1931_v50  ;;  %v1903_v50 = vld [vmem:[%s4399_s3 + $0x1c8] sm:$0xff] }
 0x12b   : > { %2056 = vmatpush1.msra.mxu0 %v1930_v44  ;;  %v1966_v44 = vld [vmem:[%s4399_s3 + $0x3c0] sm:$0xff] }
 0x12c   : > { %2057 = vmatprep.subr.mxu0 %v1929_v25  ;;  %v1965_v25 = vld [vmem:[%s4399_s3 + $0x3b8] sm:$0xff] }
 0x12d   : > { %2058 = vmatpush1.msra.mxu0 %v1928_v37  ;;  %v1964_v37 = vld [vmem:[%s4399_s3 + $0x3b0] sm:$0xff] }
 0x12e   : > { %2059 = vmatprep.subr.mxu0 %v1927_v48  ;;  %v1898_v48 = vld [vmem:[%s4399_s3 + $0x1a0] sm:$0xff] }
 0x12f   : > { %2060 = vmatpush1.msra.mxu0 %v1926_v49  ;;  %v1897_v49 = vld [vmem:[%s4399_s3 + $0x198] sm:$0xff] }
 0x130   : > { %2061 = vmatprep.subr.mxu0 %v1925_v53  ;;  %v1896_v53 = vld [vmem:[%s4399_s3 + $0x190] sm:$0xff] }
 0x131   : > { %2062 = vmatpush1.msra.mxu0 %v1924_v56  ;;  %v1959_v56 = vld [vmem:[%s4399_s3 + $0x388] sm:$0xff] }
 0x132   : > { %2063 = vmatprep.subr.mxu0 %v1923_v46  ;;  %v1958_v46 = vld [vmem:[%s4399_s3 + $0x380] sm:$0xff] }
 0x1e0   : > { %v2608_v20 = vpop.f32.mrf.mxu0 }
 0x1e1   : > { %v977_v60 = vmax.f32 %v2608_v20, 0.0  ;;  %v1922_v20 = vld [vmem:[%s4399_s3 + $0x260] sm:$0xff] }
 0x1e2   : > { %v967_v58 = vpop.f32.mrf.mxu0  ;;  %2064 = vmatpush1.msra.mxu0 %v1922_v20  ;;  %v1957_v20 = vld [vmem:[%s4399_s3 + $0x378] sm:$0xff] }
 0x1e3   : > { %v976_v59 = vmax.f32 %v967_v58, 0.0 }
 0x1e5   : > { %2611 = vmatprep.mubr.msk.f32.mxu1 %vm979_vm12, %v976_v59  ;;  %v1857_v59 = vld [vmem:[%s4399_s3 + $0x58] sm:$0xff] }
 0x1e6   : > { %2612 = vmatmul.mubr.msk.f32.vlgmr.msra.gmra.mxu1 %vm979_vm12, %v977_v60  ;;  %v1921_v60 = vld [vmem:[%s4399_s3 + $0x258] sm:$0xff] }
 0x1e7   : > { %1975 = vmatpush1.msra.mxu1 %v1876_v26  ;;  %2065 = vmatprep.subr.mxu0 %v1921_v60  ;;  %v1850_v26 = vld [vmem:[%s4399_s3 + $0x20] sm:$0xff]  ;;  %v1891_v60 = vld [vmem:[%s4399_s3 + $0x168] sm:$0xff] }
 0x1e8   : > { %1976 = vmatprep.subr.mxu1 %v1875_v29  ;;  %v1913_v29 = vld [vmem:[%s4399_s3 + $0x218] sm:$0xff] }
 0x1e9   : > { %1977 = vmatpush1.msra.mxu1 %v1874_v2  ;;  %v1847_v2 = vld [vmem:[%s4399_s3 + $0x8] sm:$0xff] }
 0x1ea   : > { %1978 = vmatprep.subr.mxu1 %v1873_v12  ;;  %v1846_v12 = vld [vmem:[%s4399_s3] sm:$0xff] }
 0x1eb   : > { %1979 = vmatpush1.msra.mxu1 %v1872_v22  ;;  %v1909_v22 = vld [vmem:[%s4399_s3 + $0x1f8] sm:$0xff] }
 0x1ec   : > { %1980 = vmatprep.subr.mxu1 %v1871_v28  ;;  %v1972_v28 = vld [vmem:[%s4399_s3 + $0x3f0] sm:$0xff] }
 0x1ed   : > { %1981 = vmatpush1.msra.mxu1 %v1870_v33  ;;  %v1971_v33 = vld [vmem:[%s4399_s3 + $0x3e8] sm:$0xff] }
 0x1ee   : > { %1982 = vmatprep.subr.mxu1 %v1869_v30  ;;  %v1970_v30 = vld [vmem:[%s4399_s3 + $0x3e0] sm:$0xff] }
 0x1ef   : > { %1983 = vmatpush1.msra.mxu1 %v1868_v39  ;;  %v1969_v39 = vld [vmem:[%s4399_s3 + $0x3d8] sm:$0xff] }
 0x1f0   : > { %1984 = vmatprep.subr.mxu1 %v1867_v47  ;;  %v1968_v47 = vld [vmem:[%s4399_s3 + $0x3d0] sm:$0xff] }
 0x1f1   : > { %1985 = vmatpush1.msra.mxu1 %v1866_v51  ;;  %v1902_v51 = vld [vmem:[%s4399_s3 + $0x1c0] sm:$0xff] }
 0x1f2   : > { %1986 = vmatprep.subr.mxu1 %v1865_v45  ;;  %v1901_v45 = vld [vmem:[%s4399_s3 + $0x1b8] sm:$0xff] }
 0x1f3   : > { %1987 = vmatpush1.msra.mxu1 %v1864_v36  ;;  %v1900_v36 = vld [vmem:[%s4399_s3 + $0x1b0] sm:$0xff] }
 0x1f4   : > { %1988 = vmatprep.subr.mxu1 %v1863_v43  ;;  %v1963_v43 = vld [vmem:[%s4399_s3 + $0x3a8] sm:$0xff] }
 0x1f5   : > { %1989 = vmatpush1.msra.mxu1 %v1862_v14  ;;  %v1962_v14 = vld [vmem:[%s4399_s3 + $0x3a0] sm:$0xff] }
 0x1f6   : > { %1990 = vmatprep.subr.mxu1 %v1861_v52  ;;  %v1961_v52 = vld [vmem:[%s4399_s3 + $0x398] sm:$0xff] }
 0x1f7   : > { %1991 = vmatpush1.msra.mxu1 %v1860_v10  ;;  %v1895_v10 = vld [vmem:[%s4399_s3 + $0x188] sm:$0xff] }
 0x1f8   : > { %1992 = vmatprep.subr.mxu1 %v1859_v57  ;;  %v1894_v57 = vld [vmem:[%s4399_s3 + $0x180] sm:$0xff] }
 0x1f9   : > { %1993 = vmatpush1.msra.mxu1 %v1858_v21  ;;  %v1893_v21 = vld [vmem:[%s4399_s3 + $0x178] sm:$0xff] }
 0x1fa   : > { %1994 = vmatprep.subr.mxu1 %v1857_v59  ;;  %v1956_v59 = vld [vmem:[%s4399_s3 + $0x370] sm:$0xff] }
 0x2a6   : > { %v2613_v61 = vpop.f32.mrf.mxu1 }
 0x2a8   : > { %v1056_v62 = vpop.f32.mrf.mxu1 }
 0x2a9   : > { %v1065_v63 = vadd.f32 %v2613_v61, %v1056_v62  ;;  %v1856_v61 = vld [vmem:[%s4399_s3 + $0x50] sm:$0xff] }
 0x2aa   : > { %v1920_v62 = vld [vmem:[%s4399_s3 + $0x250] sm:$0xff]  ;;  %1995 = vmatpush1.msra.mxu1 %v1856_v61  ;;  %v1955_v61 = vld [vmem:[%s4399_s3 + $0x368] sm:$0xff] }
 0x2ab   : > { %v2526_v1 = vmul.f32 -1.442695, %v1065_v63  ;;  %v1855_v63 = vld [vmem:[%s4399_s3 + $0x48] sm:$0xff]  ;;  %2066 = vmatpush1.msra.mxu0 %v1920_v62  ;;  %v1890_v62 = vld [vmem:[%s4399_s3 + $0x160] sm:$0xff] }
 0x2ac   : > { %1996 = vmatprep.subr.mxu1 %v1855_v63  ;;  %v1954_v63 = vld [vmem:[%s4399_s3 + $0x360] sm:$0xff] }
 0x2ad   : > { %2623 = vpow2.f32 %v2526_v1  ;;  %v1919_v1 = vld [vmem:[%s4399_s3 + $0x248] sm:$0xff] }
 0x2ae   : > { %2067 = vmatprep.subr.mxu0 %v1919_v1  ;;  %v1889_v1 = vld [vmem:[%s4399_s3 + $0x158] sm:$0xff] }
 0x2ba   : > { %v2624_v3 = vpop.eup %2623 }
 0x2bb   : > { %v1069_v4 = vadd.f32 1.0, %v2624_v3  ;;  %v1207_v3 = vsub.s32 7, %v3042_v5  ;;  %v2691_v5 = vld [vmem:[%s2767_s21 + $0x1a0] sm:$0xff] }
 0x2bd   : > { %2625 = vrcp.f32 %v1069_v4  ;;  %v1854_v4 = vld [vmem:[%s4399_s3 + $0x40] sm:$0xff] }
 0x2be   : > { %1997 = vmatpush1.msra.mxu1 %v1854_v4  ;;  %v1888_v4 = vld [vmem:[%s4399_s3 + $0x150] sm:$0xff] }
 0x2ca   : > { %v3225_v7 = vpop.eup %2625 }
 0x2cb   : > { %v3229_v8 = vrot.slane %v3225_v7, %v3223_v6  ;;  %v3238_v13 = vrot.slane %v3225_v7, %v1112_v9  ;;  %v3242_v15 = vrot.slane %v3225_v7, %v3233_v11  ;;  %v3256_v55 = vrot.slane %v3225_v7, %v1131_v16  ;;  %v1853_v9 = vld [vmem:[%s4399_s3 + $0x38] sm:$0xff]  ;;  %v1852_v16 = vld [vmem:[%s4399_s3 + $0x30] sm:$0xff] }
 0x2cc   : > { %v3286_v34 = vrot.slane %v3225_v7, %v1150_v23  ;;  %v3350_v42 = vrot.slane %v3225_v7, %v1169_v40  ;;  %v3394_v58 = vrot.slane %v3225_v7, %v1188_v54  ;;  %v3438_v18 = vrot.slane %v3225_v7, %v1207_v3  ;;  %1998 = vmatprep.subr.mxu1 %v1853_v9  ;;  %v1851_v23 = vld [vmem:[%s4399_s3 + $0x28] sm:$0xff]  ;;  %v1914_v7 = vld [vmem:[%s4399_s3 + $0x220] sm:$0xff]  ;;  %v1960_v54 = vld [vmem:[%s4399_s3 + $0x390] sm:$0xff] }
 0x2cd   : > { %1100 = vbcast.lane.b32.xlu1 %v3229_v8, 264  ;;  %1096 = vbcast.lane.b32.xlu0 %v3229_v8, 256  ;;  %v1967_v40 = vld [vmem:[%s4399_s3 + $0x3c8] sm:$0xff]  ;;  %v1953_v3 = vld [vmem:[%s4399_s3 + $0x358] sm:$0xff] }
 0x2ce   : > { %1999 = vmatpush1.msra.mxu1 %v1852_v16  ;;  %v1887_v9 = vld [vmem:[%s4399_s3 + $0x148] sm:$0xff]  ;;  %v1886_v16 = vld [vmem:[%s4399_s3 + $0x140] sm:$0xff] }
 0x2cf   : > { %2000 = vmatprep.subr.mxu1 %v1851_v23  ;;  %v1949_v23 = vld [vmem:[%s4399_s3 + $0x338] sm:$0xff] }
 0x2d0   : > { %2001 = vmatpush1.msra.mxu1 %v1850_v26  ;;  %v1948_v26 = vld [vmem:[%s4399_s3 + $0x330] sm:$0xff] }
 0x2d1   : > { %1115 = vbcast.lane.b32.xlu1 %v3238_v13, 256  ;;  %1077 = vbcast.lane.b32.xlu0 %v3242_v15, 256 }
 0x2d2   : > { %2002 = vmatprep.subr.mxu1 %v1849_v27  ;;  %v1947_v27 = vld [vmem:[%s4399_s3 + $0x328] sm:$0xff] }
 0x2d3   : > { %2003 = vmatpush1.msra.mxu1 %v1848_v0  ;;  %v1946_v0 = vld [vmem:[%s4399_s3 + $0x320] sm:$0xff] }
 0x2d4   : > { %2004 = vmatprep.subr.mxu1 %v1847_v2  ;;  %v1945_v2 = vld [vmem:[%s4399_s3 + $0x318] sm:$0xff] }
 0x2d5   : > { %1119 = vbcast.lane.b32.xlu1 %v3238_v13, 264  ;;  %1104 = vbcast.lane.b32.xlu0 %v3229_v8, 272 }
 0x2d6   : > { %2005 = vmatpush1.msra.mxu1 %v1846_v12  ;;  %v1944_v12 = vld [vmem:[%s4399_s3 + $0x310] sm:$0xff] }
 0x2d7   : > { %2006 = vmatprep.subr.mxu1 %v1909_v22  ;;  %v1943_v22 = vld [vmem:[%s4399_s3 + $0x308] sm:$0xff] }
 0x2d8   : > { %2007 = vmatpush2.msra.mxu1 %v1908_v24  ;;  %v1942_v24 = vld [vmem:[%s4399_s3 + $0x300] sm:$0xff] }
 0x2d9   : > { %1081 = vbcast.lane.b32.xlu1 %v3242_v15, 264  ;;  %1138 = vbcast.lane.b32.xlu0 %v3256_v55, 264 }
 0x2da   : > { %2008 = vmatprep.subr.mxu1 %v1907_v35 }
 0x2db   : > { %2009 = vmatpush2.msra.mxu1 %v1906_v38 }
 0x2dc   : > { %2010 = vmatprep.subr.mxu1 %v1905_v31 }
 0x2dd   : > { %1134 = vbcast.lane.b32.xlu1 %v3256_v55, 256  ;;  %1153 = vbcast.lane.b32.xlu0 %v3286_v34, 256 }
 0x2de   : > { %2011 = vmatpush2.msra.mxu1 %v1904_v41 }
 0x2df   : > { %2012 = vmatprep.subr.mxu1 %v1903_v50 }
 0x2e0   : > { %2013 = vmatpush2.msra.mxu1 %v1902_v51 }
 0x2e1   : > { %1123 = vbcast.lane.b32.xlu1 %v3238_v13, 272  ;;  %1085 = vbcast.lane.b32.xlu0 %v3242_v15, 272 }
 0x2e2   : > { %2014 = vmatprep.subr.mxu1 %v1901_v45 }
 0x2e3   : > { %2015 = vmatpush2.msra.mxu1 %v1900_v36 }
 0x2e5   : > { %1157 = vbcast.lane.b32.xlu1 %v3286_v34, 264  ;;  %1142 = vbcast.lane.b32.xlu0 %v3256_v55, 272 }
 0x2e9   : > { %1108 = vbcast.lane.b32.xlu1 %v3229_v8, 280  ;;  %1176 = vbcast.lane.b32.xlu0 %v3350_v42, 264  ;;  %v1918_v8 = vld [vmem:[%s4399_s3 + $0x240] sm:$0xff] }
 0x2ea   : > { %2068 = vmatpush1.msra.mxu0 %v1918_v8  ;;  %v1952_v8 = vld [vmem:[%s4399_s3 + $0x350] sm:$0xff] }
 0x2ed   : > { %1172 = vbcast.lane.b32.xlu1 %v3350_v42, 256  ;;  %1161 = vbcast.lane.b32.xlu0 %v3286_v34, 272 }
 0x2f1   : > { %1127 = vbcast.lane.b32.xlu1 %v3238_v13, 280  ;;  %1195 = vbcast.lane.b32.xlu0 %v3394_v58, 264  ;;  %v1917_v13 = vld [vmem:[%s4399_s3 + $0x238] sm:$0xff] }
 0x2f2   : > { %2069 = vmatprep.subr.mxu0 %v1917_v13  ;;  %v1951_v13 = vld [vmem:[%s4399_s3 + $0x348] sm:$0xff] }
 0x2f3   : > { %2070 = vmatpush1.msra.mxu0 %v1916_v17  ;;  %v1950_v17 = vld [vmem:[%s4399_s3 + $0x340] sm:$0xff] }
 0x2f5   : > { %1191 = vbcast.lane.b32.xlu1 %v3394_v58, 256  ;;  %1146 = vbcast.lane.b32.xlu0 %v3256_v55, 280  ;;  %v1915_v55 = vld [vmem:[%s4399_s3 + $0x228] sm:$0xff] }
 0x2f6   : > { %2071 = vmatprep.subr.mxu0 %v1915_v55  ;;  %v1884_v55 = vld [vmem:[%s4399_s3 + $0x130] sm:$0xff] }
 0x2f7   : > { %2072 = vmatpush1.msra.mxu0 %v1914_v7  ;;  %v1883_v7 = vld [vmem:[%s4399_s3 + $0x128] sm:$0xff] }
 0x2f8   : > { %2073 = vmatprep.subr.mxu0 %v1913_v29  ;;  %v1882_v29 = vld [vmem:[%s4399_s3 + $0x120] sm:$0xff] }
 0x2f9   : > { %1089 = vbcast.lane.b32.xlu1 %v3242_v15, 280  ;;  %1210 = vbcast.lane.b32.xlu0 %v3438_v18, 256  ;;  %v1912_v15 = vld [vmem:[%s4399_s3 + $0x210] sm:$0xff] }
 0x2fa   : > { %2074 = vmatpush1.msra.mxu0 %v1912_v15  ;;  %v1881_v15 = vld [vmem:[%s4399_s3 + $0x118] sm:$0xff] }
 0x2fb   : > { %2075 = vmatprep.subr.mxu0 %v1911_v32  ;;  %v1880_v32 = vld [vmem:[%s4399_s3 + $0x110] sm:$0xff] }
 0x2fc   : > { %2076 = vmatpush1.msra.mxu0 %v1910_v19  ;;  %v1879_v19 = vld [vmem:[%s4399_s3 + $0x108] sm:$0xff] }
 0x2fd   : > { %1180 = vbcast.lane.b32.xlu1 %v3350_v42, 272  ;;  %1165 = vbcast.lane.b32.xlu0 %v3286_v34, 280  ;;  %v1973_v34 = vld [vmem:[%s4399_s3 + $0x3f8] sm:$0xff] }
 0x2fe   : > { %2077 = vmatprep.subr.mxu0 %v1973_v34  ;;  %v1878_v34 = vld [vmem:[%s4399_s3 + $0x100] sm:$0xff] }
 0x2ff   : > { %2078 = vmatpush2.msra.mxu0 %v1972_v28 }
 0x300   : > { %2079 = vmatprep.subr.mxu0 %v1971_v33  ;;  %v2635_v33 = vld [vmem:[%s2767_s21 + $0x50] sm:$0xff] }
 0x301   : > { %1214 = vbcast.lane.b32.xlu1 %v3438_v18, 264  ;;  %1184 = vbcast.lane.b32.xlu0 %v3350_v42, 280  ;;  %v1899_v42 = vld [vmem:[%s4399_s3 + $0x1a8] sm:$0xff] }
 0x302   : > { %2080 = vmatpush2.msra.mxu0 %v1970_v30  ;;  %2016 = vmatprep.subr.mxu1 %v1899_v42  ;;  %v2636_v30 = vld [vmem:[%s2767_s21 + $0x40] sm:$0xff] }
 0x303   : > { %2081 = vmatprep.subr.mxu0 %v1969_v39  ;;  %2017 = vmatpush2.msra.mxu1 %v1898_v48 }
 0x304   : > { %2082 = vmatpush2.msra.mxu0 %v1968_v47  ;;  %2018 = vmatprep.subr.mxu1 %v1897_v49  ;;  %v2637_v47 = vld [vmem:[%s2767_s21 + $0x80] sm:$0xff] }
 0x305   : > { %1199 = vbcast.lane.b32.xlu1 %v3394_v58, 272  ;;  %1203 = vbcast.lane.b32.xlu0 %v3394_v58, 280  ;;  %v1892_v58 = vld [vmem:[%s4399_s3 + $0x170] sm:$0xff] }
 0x306   : > { %2083 = vmatprep.subr.mxu0 %v1967_v40  ;;  %2019 = vmatpush2.msra.mxu1 %v1896_v53  ;;  %v2638_v40 = vld [vmem:[%s2767_s21] sm:$0xff] }
 0x307   : > { %2084 = vmatpush2.msra.mxu0 %v1966_v44  ;;  %2020 = vmatprep.subr.mxu1 %v1895_v10 }
 0x308   : > { %2085 = vmatprep.subr.mxu0 %v1965_v25  ;;  %2021 = vmatpush2.msra.mxu1 %v1894_v57  ;;  %v2639_v25 = vld [vmem:[%s2767_s21 + $0x90] sm:$0xff] }
 0x309   : > { %1218 = vbcast.lane.b32.xlu1 %v3438_v18, 272  ;;  %2086 = vmatpush2.msra.mxu0 %v1964_v37  ;;  %v2640_v37 = vld [vmem:[%s2767_s21 + $0x60] sm:$0xff] }
 0x30a   : > { %2087 = vmatprep.subr.mxu0 %v1963_v43  ;;  %2022 = vmatprep.subr.mxu1 %v1893_v21 }
 0x30b   : > { %2088 = vmatpush2.msra.mxu0 %v1962_v14  ;;  %2023 = vmatpush2.msra.mxu1 %v1892_v58  ;;  %v2641_v14 = vld [vmem:[%s2767_s21 + $0x10] sm:$0xff] }
 0x30c   : > { %2089 = vmatprep.subr.mxu0 %v1961_v52  ;;  %2024 = vmatprep.subr.mxu1 %v1891_v60  ;;  %v2642_v52 = vld [vmem:[%s2767_s21 + $0xd0] sm:$0xff] }
 0x30d   : > { %1222 = vbcast.lane.b32.xlu1 %v3438_v18, 280  ;;  %2090 = vmatpush2.msra.mxu0 %v1960_v54  ;;  %v1885_v18 = vld [vmem:[%s4399_s3 + $0x138] sm:$0xff] }
 0x30e   : > { %2091 = vmatprep.subr.mxu0 %v1959_v56  ;;  %2025 = vmatpush2.msra.mxu1 %v1890_v62  ;;  %v2643_v56 = vld [vmem:[%s2767_s21 + $0xc0] sm:$0xff] }
 0x30f   : > { %2092 = vmatpush2.msra.mxu0 %v1958_v46  ;;  %2026 = vmatprep.subr.mxu1 %v1889_v1  ;;  %v2644_v46 = vld [vmem:[%s2767_s21 + $0x100] sm:$0xff] }
 0x310   : > { %2093 = vmatprep.subr.mxu0 %v1957_v20  ;;  %2027 = vmatpush2.msra.mxu1 %v1888_v4  ;;  %v2645_v20 = vld [vmem:[%s2767_s21 + $0x58] sm:$0xff] }
 0x311   : > { %2094 = vmatpush2.msra.mxu0 %v1956_v59  ;;  %2028 = vmatprep.subr.mxu1 %v1887_v9  ;;  %v2646_v59 = vld [vmem:[%s2767_s21 + $0x48] sm:$0xff] }
 0x312   : > { %2095 = vmatprep.subr.mxu0 %v1955_v61  ;;  %2029 = vmatpush2.msra.mxu1 %v1886_v16 }
 0x313   : > { %2096 = vmatpush2.msra.mxu0 %v1954_v63  ;;  %2030 = vmatprep.subr.mxu1 %v1885_v18  ;;  %v2647_v63 = vld [vmem:[%s2767_s21 + $0xa0] sm:$0xff] }
 0x314   : > { %2097 = vmatprep.subr.mxu0 %v1953_v3  ;;  %2031 = vmatpush2.msra.mxu1 %v1884_v55  ;;  %v2648_v3 = vld [vmem:[%s2767_s21 + $0x20] sm:$0xff] }
 0x315   : > { %2098 = vmatpush2.msra.mxu0 %v1952_v8  ;;  %2032 = vmatprep.subr.mxu1 %v1883_v7  ;;  %v2649_v8 = vld [vmem:[%s2767_s21 + $0x98] sm:$0xff] }
 0x316   : > { %2099 = vmatprep.subr.mxu0 %v1951_v13  ;;  %2033 = vmatpush2.msra.mxu1 %v1882_v29  ;;  %v2650_v13 = vld [vmem:[%s2767_s21 + $0x68] sm:$0xff] }
 0x317   : > { %2100 = vmatpush2.msra.mxu0 %v1950_v17  ;;  %2034 = vmatprep.subr.mxu1 %v1881_v15  ;;  %v2651_v17 = vld [vmem:[%s2767_s21 + $0x88] sm:$0xff] }
 0x318   : > { %2101 = vmatprep.subr.mxu0 %v1949_v23  ;;  %2035 = vmatpush2.msra.mxu1 %v1880_v32  ;;  %v2652_v23 = vld [vmem:[%s2767_s21 + $0x18] sm:$0xff]  ;;  %v2653_v15 = vld [vmem:[%s2767_s21 + $0xc8] sm:$0xff]  ;;  %v2654_v32 = vld [vmem:[%s2767_s21 + $0x110] sm:$0xff] }
 0x319   : > { %2102 = vmatpush2.msra.mxu0 %v1948_v26  ;;  %2036 = vmatprep.subr.mxu1 %v1879_v19  ;;  %v2655_v19 = vld [vmem:[%s2767_s21 + $0xe0] sm:$0xff] }
 0x31a   : > { %2103 = vmatprep.subr.mxu0 %v1947_v27  ;;  %2037 = vmatpush2.msra.mxu1 %v1878_v34  ;;  %v2656_v34 = vld [vmem:[%s2767_s21 + $0x8] sm:$0xff] }
 0x31b   : > { %2104 = vmatpush2.msra.mxu0 %v1946_v0 }
 0x31c   : > { %2105 = vmatprep.subr.mxu0 %v1945_v2 }
 0x31d   : > { %2106 = vmatpush2.msra.mxu0 %v1944_v12 }
 0x31e   : > { %2107 = vmatprep.subr.mxu0 %v1943_v22 }
 0x31f   : > { %2108 = vmatpush2.msra.mxu0 %v1942_v24 }
 0x33f   : > { %v1101_v28 = vpop.permute.xlu1 %1100  ;;  %v1097_v35 = vpop.permute.xlu0 %1096 }
 0x340   : > { %v1234_v38 = vmul.f32 %v2635_v33, %v1101_v28  ;;  %v1232_v31 = vmul.f32 %v2636_v30, %v1097_v35  ;;  %v3709_v58 = vmul.f32 %v2645_v20, %v1101_v28  ;;  %v3712_v60 = vmul.f32 %v2646_v59, %v1097_v35  ;;  %v2657_v28 = vld [vmem:[%s2767_s21 + $0x28] sm:$0xff]  ;;  %v2658_v30 = vld [vmem:[%s2767_s21 + $0xd8] sm:$0xff] }
 0x342   : > { %1298 = vst [vmem:[%s3683_s26 + $0x50] sm:$0xff] %v1234_v38  ;;  %1296 = vst [vmem:[%s3683_s26 + $0x40] sm:$0xff] %v1232_v31  ;;  %v1417_v27 = vadd.f32 %v3709_v58, %v3712_v60 }
 0x343   : > { %v1116_v39 = vpop.permute.xlu1 %1115  ;;  %v3689_v41 = vpop.permute.xlu0 %1077  ;;  %4443 = vst [vmem:[#allocation5_spill] sm:$0xff] %v3709_v58  ;;  %4444 = vst [vmem:[#allocation6_spill] sm:$0xff] %v3712_v60 }
 0x344   : > { %v1240_v50 = vmul.f32 %v2637_v47, %v1116_v39  ;;  %v1224_v51 = vmul.f32 %v2638_v40, %v3689_v41  ;;  %v3725_v18 = vmul.f32 %v2651_v17, %v1116_v39  ;;  %v3745_v24 = vmul.f32 %v2656_v34, %v3689_v41  ;;  %v2659_v39 = vld [vmem:[%s2767_s21 + $0xa8] sm:$0xff] }
 0x345   : > { %v2667_v34 = vld [vmem:[%s2767_s21 + $0x148] sm:$0xff] }
 0x346   : > { %1304 = vst [vmem:[%s3683_s26 + $0x80] sm:$0xff] %v1240_v50  ;;  %1288 = vst [vmem:[%s3683_s26] sm:$0xff] %v1224_v51 }
 0x347   : > { %v1120_v44 = vpop.permute.xlu1 %1119  ;;  %v1105_v45 = vpop.permute.xlu0 %1104  ;;  %4447 = vst [vmem:[#allocation9_spill] sm:$0xff] %v3725_v18  ;;  %4450 = vst [vmem:[#allocation12_spill] sm:$0xff] %v3745_v24 }
 0x348   : > { %v1242_v36 = vmul.f32 %v2639_v25, %v1120_v44  ;;  %v1236_v42 = vmul.f32 %v2640_v37, %v1105_v45  ;;  %v3717_v9 = vmul.f32 %v2649_v8, %v1120_v44  ;;  %v3720_v16 = vmul.f32 %v2650_v13, %v1105_v45  ;;  %v2660_v44 = vld [vmem:[%s2767_s21 + $0x108] sm:$0xff]  ;;  %v2661_v25 = vld [vmem:[%s2767_s21 + $0x118] sm:$0xff] }
 0x349   : > { %v3733_v29 = vld [vmem:[%s3683_s26 + $0x40] sm:$0xff]  ;;  %v3736_v0 = vld [vmem:[%s3683_s26 + $0x50] sm:$0xff]  ;;  %v2662_v37 = vld [vmem:[%s2767_s21 + $0xe8] sm:$0xff] }
 0x34a   : > { %1306 = vst [vmem:[%s3683_s26 + $0x90] sm:$0xff] %v1242_v36  ;;  %1300 = vst [vmem:[%s3683_s26 + $0x60] sm:$0xff] %v1236_v42  ;;  %v1418_v33 = vadd.f32 %v1417_v27, %v3720_v16  ;;  %v1464_v38 = vadd.f32 %v3717_v9, %v3725_v18  ;;  %v1437_v41 = vmax.f32 %v3712_v60, %v3720_v16  ;;  %v2684_v60 = vld [vmem:[%s2767_s21 + $0x168] sm:$0xff] }
 0x34b   : > { %v1082_v43 = vpop.permute.xlu1 %1081  ;;  %v1139_v48 = vpop.permute.xlu0 %1138  ;;  %4445 = vst [vmem:[#allocation7_spill] sm:$0xff] %v3717_v9  ;;  %4446 = vst [vmem:[#allocation8_spill] sm:$0xff] %v3720_v16  ;;  %v1408_v40 = vadd.f32 %v3736_v0, %v3733_v29 }
 0x34c   : > { %v1226_v49 = vmul.f32 %v2641_v14, %v1082_v43  ;;  %v1250_v53 = vmul.f32 %v2642_v52, %v1139_v48  ;;  %v3728_v55 = vmul.f32 %v2652_v23, %v1082_v43  ;;  %v3754_v31 = vmul.f32 %v2658_v30, %v1139_v48  ;;  %v2669_v30 = vld [vmem:[%s2767_s21 + $0x128] sm:$0xff] }
 0x34d   : > { %v3817_v8 = vld [vmem:[%s3683_s26] sm:$0xff] }
 0x34e   : > { %1290 = vst [vmem:[%s3683_s26 + $0x10] sm:$0xff] %v1226_v49  ;;  %1314 = vst [vmem:[%s3683_s26 + $0xd0] sm:$0xff] %v1250_v53  ;;  %v1369_v14 = vadd.f32 %v3728_v55, %v3745_v24  ;;  %v2663_v49 = vld [vmem:[%s2767_s21 + $0x70] sm:$0xff]  ;;  %v2664_v53 = vld [vmem:[%s2767_s21 + $0x78] sm:$0xff] }
 0x34f   : > { %v1135_v54 = vpop.permute.xlu1 %1134  ;;  %v1154_v10 = vpop.permute.xlu0 %1153  ;;  %4448 = vst [vmem:[#allocation10_spill] sm:$0xff] %v3728_v55  ;;  %4452 = vst [vmem:[#allocation14_spill] sm:$0xff] %v3754_v31 }
 0x350   : > { %v1248_v57 = vmul.f32 %v2643_v56, %v1135_v54  ;;  %v1256_v21 = vmul.f32 %v2644_v46, %v1154_v10  ;;  %v3739_v2 = vmul.f32 %v2653_v15, %v1135_v54  ;;  %v3772_v45 = vmul.f32 %v2660_v44, %v1154_v10  ;;  %v2665_v10 = vld [vmem:[%s2767_s21 + $0x150] sm:$0xff] }
 0x351   : > { %v3764_v50 = vld [vmem:[%s3683_s26 + $0x60] sm:$0xff]  ;;  %v3769_v51 = vld [vmem:[%s3683_s26 + $0x90] sm:$0xff] }
 0x352   : > { %1312 = vst [vmem:[%s3683_s26 + $0xc0] sm:$0xff] %v1248_v57  ;;  %1320 = vst [vmem:[%s3683_s26 + $0x100] sm:$0xff] %v1256_v21  ;;  %v1511_v57 = vadd.f32 %v3754_v31, %v3739_v2  ;;  %v3795_v21 = vld [vmem:[%s3683_s26 + $0x80] sm:$0xff]  ;;  %v3801_v59 = vadd.f32 %v3764_v50, %v1408_v40 }
 0x353   : > { %v1124_v61 = vpop.permute.xlu1 %1123  ;;  %v1086_v62 = vpop.permute.xlu0 %1085  ;;  %4449 = vst [vmem:[#allocation11_spill] sm:$0xff] %v3739_v2  ;;  %4454 = vst [vmem:[#allocation16_spill] sm:$0xff] %v3769_v51 }
 0x354   : > { %v1244_v1 = vmul.f32 %v2647_v63, %v1124_v61  ;;  %v1228_v4 = vmul.f32 %v2648_v3, %v1086_v62  ;;  %v3748_v35 = vmul.f32 %v2657_v28, %v1086_v62  ;;  %v3757_v47 = vmul.f32 %v2659_v39, %v1124_v61  ;;  %4458 = vst [vmem:[#allocation20_spill] sm:$0xff] %v3795_v21 }
 0x355   : > { %v3792_v46 = vld [vmem:[%s3683_s26 + $0x10] sm:$0xff]  ;;  %v1455_v61 = vadd.f32 %v3769_v51, %v3795_v21 }
 0x356   : > { %1308 = vst [vmem:[%s3683_s26 + $0xa0] sm:$0xff] %v1244_v1  ;;  %1292 = vst [vmem:[%s3683_s26 + $0x20] sm:$0xff] %v1228_v4  ;;  %v3798_v20 = vadd.f32 %v1369_v14, %v3748_v35  ;;  %v1465_v1 = vadd.f32 %v1464_v38, %v3757_v47  ;;  %v3846_v40 = vld [vmem:[%s3683_s26 + $0xd0] sm:$0xff]  ;;  %v2670_v14 = vld [vmem:[%s2767_s21 + $0x158] sm:$0xff] }
 0x357   : > { %v1158_v26 = vpop.permute.xlu1 %1157  ;;  %v1143_v7 = vpop.permute.xlu0 %1142  ;;  %4451 = vst [vmem:[#allocation13_spill] sm:$0xff] %v3748_v35  ;;  %4453 = vst [vmem:[#allocation15_spill] sm:$0xff] %v3757_v47 }
 0x358   : > { %v1258_v12 = vmul.f32 %v2654_v32, %v1158_v26  ;;  %v1252_v22 = vmul.f32 %v2655_v19, %v1143_v7  ;;  %v3775_v36 = vmul.f32 %v2661_v25, %v1158_v26  ;;  %v3778_v42 = vmul.f32 %v2662_v37, %v1143_v7  ;;  %v2666_v19 = vld [vmem:[%s2767_s21 + $0x140] sm:$0xff]  ;;  %4461 = vst [vmem:[#allocation23_spill] sm:$0xff] %v3846_v40 }
 0x359   : > { %v3820_v13 = vld [vmem:[%s3683_s26 + $0xc0] sm:$0xff]  ;;  %v1360_v32 = vadd.f32 %v3792_v46, %v3817_v8 }
 0x35a   : > { %1322 = vst [vmem:[%s3683_s26 + $0x110] sm:$0xff] %v1258_v12  ;;  %1316 = vst [vmem:[%s3683_s26 + $0xe0] sm:$0xff] %v1252_v22  ;;  %v3823_v26 = vadd.f32 %v1511_v57, %v3778_v42  ;;  %v1558_v7 = vadd.f32 %v3775_v36, %v3772_v45  ;;  %v2675_v37 = vld [vmem:[%s2767_s21 + $0x180] sm:$0xff] }
 0x35b   : > { %4455 = vst [vmem:[#allocation17_spill] sm:$0xff] %v3778_v42  ;;  %v1109_v43 = vpop.permute.xlu1 %1108  ;;  %v1177_v48 = vpop.permute.xlu0 %1176  ;;  %4459 = vst [vmem:[#allocation21_spill] sm:$0xff] %v3820_v13 }
 0x35c   : > { %v3783_v52 = vmul.f32 %v2663_v49, %v1109_v43  ;;  %v3786_v54 = vmul.f32 %v2664_v53, %v1109_v43  ;;  %v1266_v56 = vmul.f32 %v2665_v10, %v1177_v48  ;;  %v1502_v43 = vadd.f32 %v3846_v40, %v3820_v13 }
 0x35d   : > { %v3830_v15 = vld [vmem:[%s3683_s26 + $0x20] sm:$0xff]  ;;  %v3853_v49 = vmul.f32 %v2670_v14, %v1177_v48 }
 0x35e   : > { %4456 = vst [vmem:[#allocation18_spill] sm:$0xff] %v3783_v52  ;;  %4457 = vst [vmem:[#allocation19_spill] sm:$0xff] %v3786_v54  ;;  %v1419_v63 = vadd.f32 %v1418_v33, %v3786_v54  ;;  %v1438_v4 = vmax.f32 %v3709_v58, %v3786_v54  ;;  %v3835_v12 = vld [vmem:[%s3683_s26 + $0xa0] sm:$0xff]  ;;  %v3858_v53 = vadd.f32 %v1360_v32, %v3830_v15  ;;  %v2682_v58 = vld [vmem:[%s2767_s21 + $0x1c8] sm:$0xff] }
 0x35f   : > { %1302 = vst [vmem:[%s3683_s26 + $0x70] sm:$0xff] %v3783_v52  ;;  %1330 = vst [vmem:[%s3683_s26 + $0x150] sm:$0xff] %v1266_v56  ;;  %v1173_v17 = vpop.permute.xlu1 %1172  ;;  %v1162_v23 = vpop.permute.xlu0 %1161  ;;  %v2668_v33 = vld [vmem:[%s2767_s21 + $0x120] sm:$0xff]  ;;  %v4470_v52 = vmax.f32 %v3725_v18, %v3757_v47 }
 0x360   : > { %4460 = vst [vmem:[#allocation22_spill] sm:$0xff] %v3835_v12  ;;  %v1264_v22 = vmul.f32 %v2666_v19, %v1173_v17  ;;  %v3839_v28 = vmul.f32 %v2667_v34, %v1173_v17  ;;  %v1260_v38 = vmul.f32 %v2668_v33, %v1162_v23  ;;  %v3843_v39 = vmul.f32 %v2669_v30, %v1162_v23  ;;  %v2671_v19 = vld [vmem:[%s2767_s21 + $0xb0] sm:$0xff]  ;;  %v2672_v34 = vld [vmem:[%s2767_s21 + $0xb8] sm:$0xff]  ;;  %v2681_v18 = vld [vmem:[%s2767_s21 + $0x1c0] sm:$0xff] }
 0x361   : > { %v1420_v44 = vrot.slane %v1419_v63, 4  ;;  %v1439_v25 = vmax.f32 %v1437_v41, %v1438_v4  ;;  %v3861_v41 = vadd.f32 %v3835_v12, %v1455_v61  ;;  %v3864_v10 = vld [vmem:[%s3683_s26 + $0xe0] sm:$0xff]  ;;  %v3872_v32 = vld [vmem:[%s3683_s26 + $0x110] sm:$0xff]  ;;  %v2694_v12 = vld [vmem:[%s2767_s21 + $0x1b8] sm:$0xff] }
 0x362   : > { %1328 = vst [vmem:[%s3683_s26 + $0x140] sm:$0xff] %v1264_v22  ;;  %1324 = vst [vmem:[%s3683_s26 + $0x120] sm:$0xff] %v1260_v38  ;;  %v3869_v17 = vadd.f32 %v1558_v7, %v3843_v39  ;;  %v3885_v7 = vadd.f32 %v3853_v49, %v3839_v28 }
 0x363   : > { %4462 = vst [vmem:[#allocation24_spill] sm:$0xff] %v3864_v10  ;;  %v1128_v57 = vpop.permute.xlu1 %1127  ;;  %v1196_v4 = vpop.permute.xlu0 %1195  ;;  %v1421_v48 = vadd.f32 %v1420_v44, %v1419_v63  ;;  %v1440_v23 = vrot.slane %v1439_v25, 4  ;;  %4463 = vst [vmem:[#allocation25_spill] sm:$0xff] %v3872_v32  ;;  %v2673_v63 = vld [vmem:[%s2767_s21 + $0x190] sm:$0xff] }
 0x364   : > { %v3877_v22 = vmul.f32 %v2671_v19, %v1128_v57  ;;  %v3880_v33 = vmul.f32 %v2672_v34, %v1128_v57  ;;  %v1274_v38 = vmul.f32 %v2673_v63, %v1196_v4  ;;  %v3893_v19 = vadd.f32 %v3864_v10, %v1502_v43  ;;  %v3896_v57 = vld [vmem:[%s3683_s26 + $0x100] sm:$0xff]  ;;  %v2674_v63 = vld [vmem:[%s2767_s21 + $0x198] sm:$0xff] }
 0x365   : > { %v1422_v30 = vrot.slane %v1421_v48, 2  ;;  %v1441_v44 = vmax.f32 %v1439_v25, %v1440_v23  ;;  %4466 = vst [vmem:[#allocation28_spill] sm:$0xff] %v3896_v57  ;;  %v3910_v43 = vadd.f32 %v3872_v32, %v3896_v57  ;;  %v3913_v61 = vmul.f32 %v2674_v63, %v1196_v4  ;;  %v2678_v4 = vld [vmem:[%s2767_s21 + $0xf8] sm:$0xff] }
 0x366   : > { %4464 = vst [vmem:[#allocation26_spill] sm:$0xff] %v3877_v22  ;;  %4465 = vst [vmem:[#allocation27_spill] sm:$0xff] %v3880_v33  ;;  %v3890_v62 = vld [vmem:[%s3683_s26 + $0x70] sm:$0xff]  ;;  %v1466_v34 = vadd.f32 %v1465_v1, %v3880_v33  ;;  %v1485_v25 = vmax.f32 %v3717_v9, %v3880_v33 }
 0x367   : > { %1310 = vst [vmem:[%s3683_s26 + $0xb0] sm:$0xff] %v3877_v22  ;;  %1338 = vst [vmem:[%s3683_s26 + $0x190] sm:$0xff] %v1274_v38  ;;  %v3906_v23 = vadd.f32 %v3890_v62, %v3801_v59  ;;  %v1192_v56 = vpop.permute.xlu1 %1191  ;;  %v1147_v38 = vpop.permute.xlu0 %1146  ;;  %v1423_v14 = vadd.f32 %v1422_v30, %v1421_v48  ;;  %v1442_v1 = vrot.slane %v1441_v44, 2  ;;  %v2676_v59 = vld [vmem:[%s2767_s21 + $0x188] sm:$0xff]  ;;  %v2677_v22 = vld [vmem:[%s2767_s21 + $0xf0] sm:$0xff] }
 0x368   : > { %v3918_v27 = vmul.f32 %v2675_v37, %v1192_v56  ;;  %v3921_v33 = vmul.f32 %v2676_v59, %v1192_v56  ;;  %v3924_v9 = vmul.f32 %v2677_v22, %v1147_v38  ;;  %v3927_v63 = vmul.f32 %v2678_v4, %v1147_v38 }
 0x369   : > { %v1424_v54 = vrot.slane %v1423_v14, 1  ;;  %v1467_v48 = vrot.slane %v1466_v34, 4  ;;  %v1443_v30 = vmax.f32 %v1441_v44, %v1442_v1  ;;  %v1486_v3 = vmax.f32 %v4470_v52, %v1485_v25 }
 0x36a   : > { %4467 = vst [vmem:[#allocation29_spill] sm:$0xff] %v3918_v27  ;;  %4468 = vst [vmem:[#allocation30_spill] sm:$0xff] %v3924_v9  ;;  %v1513_v37 = vadd.f32 %v3823_v26, %v3927_v63  ;;  %v3940_v56 = vadd.f32 %v3913_v61, %v3921_v33  ;;  %v1532_v22 = vmax.f32 %v3754_v31, %v3927_v63  ;;  %v2680_v26 = vld [vmem:[%s2767_s21 + $0x38] sm:$0xff] }
 0x36b   : > { %4469 = vst [vmem:[#allocation31_spill] sm:$0xff] %v3927_v63  ;;  %1336 = vst [vmem:[%s3683_s26 + $0x180] sm:$0xff] %v3918_v27  ;;  %v1090_v38 = vpop.permute.xlu1 %1089  ;;  %v1211_v52 = vpop.permute.xlu0 %1210  ;;  %v1425_v25 = vadd.f32 %v1424_v54, %v1423_v14  ;;  %v1468_v1 = vadd.f32 %v1467_v48, %v1466_v34  ;;  %v1444_v59 = vrot.slane %v1443_v30, 1  ;;  %v1487_v4 = vrot.slane %v1486_v3, 4  ;;  %v2679_v27 = vld [vmem:[%s2767_s21 + $0x30] sm:$0xff] }
 0x36c   : > { %1318 = vst [vmem:[%s3683_s26 + $0xf0] sm:$0xff] %v3924_v9  ;;  %v3946_v9 = vmul.f32 %v2679_v27, %v1090_v38  ;;  %v3949_v47 = vmul.f32 %v2680_v26, %v1090_v38  ;;  %v3952_v16 = vmul.f32 %v2681_v18, %v1211_v52  ;;  %v3955_v63 = vmul.f32 %v2682_v58, %v1211_v52 }
 0x36d   : > { %v3957_v44 = vmul.f32 0.03125, %v1425_v25  ;;  %v1469_v54 = vrot.slane %v1468_v1, 2  ;;  %v1514_v14 = vrot.slane %v1513_v37, 4  ;;  %v3959_v34 = vmax.f32 %v1443_v30, %v1444_v59 }
 0x36e   : > { %4471 = vst [vmem:[#allocation32_spill] sm:$0xff] %v3949_v47  ;;  %4472 = vst [vmem:[#allocation33_spill] sm:$0xff] %v3952_v16  ;;  %v1371_v27 = vadd.f32 %v3798_v20, %v3949_v47  ;;  %v1391_v18 = vmax.f32 %v3728_v55, %v3949_v47  ;;  %v1488_v58 = vmax.f32 %v1486_v3, %v1487_v4  ;;  %v2683_v20 = vld [vmem:[%s2767_s21 + $0x160] sm:$0xff]  ;;  %v2685_v3 = vld [vmem:[%s2767_s21 + $0x130] sm:$0xff] }
 0x36f   : > { %1344 = vst [vmem:[%s3683_s26 + $0x1c0] sm:$0xff] %v3952_v16  ;;  %v4473_v48 = vmax.f32 %v3739_v2, %v3778_v42  ;;  %v1181_v52 = vpop.permute.xlu1 %1180  ;;  %v1166_v25 = vpop.permute.xlu0 %1165  ;;  %v1470_v30 = vadd.f32 %v1469_v54, %v1468_v1  ;;  %v1515_v59 = vadd.f32 %v1514_v14, %v1513_v37  ;;  %v4476_v14 = vmax.f32 %v3745_v24, %v3748_v35 }
 0x370   : > { %v3975_v31 = vmul.f32 %v2683_v20, %v1181_v52  ;;  %v3978_v47 = vmul.f32 %v2684_v60, %v1181_v52  ;;  %v3981_v4 = vmul.f32 %v2685_v3, %v1166_v25  ;;  %v1372_v1 = vrot.slane %v1371_v27, 4 }
 0x371   : > { %v3970_v38 = vmax.f32 %v4473_v48, %v1532_v22  ;;  %v2686_v22 = vld [vmem:[%s2767_s21 + $0x138] sm:$0xff]  ;;  %v1471_v54 = vrot.slane %v1470_v30, 1  ;;  %v1516_v37 = vrot.slane %v1515_v59, 2  ;;  %v1392_v16 = vmax.f32 %v4476_v14, %v1391_v18  ;;  %v2687_v14 = vld [vmem:[%s2767_s21 + $0x1d0] sm:$0xff] }
 0x372   : > { %4474 = vst [vmem:[#allocation34_spill] sm:$0xff] %v3975_v31  ;;  %v3984_v48 = vmul.f32 %v2686_v22, %v1166_v25  ;;  %1332 = vst [vmem:[%s3683_s26 + $0x160] sm:$0xff] %v3975_v31  ;;  %v1606_v52 = vadd.f32 %v3885_v7, %v3978_v47  ;;  %v1489_v25 = vrot.slane %v1488_v58, 2  ;;  %v1373_v26 = vadd.f32 %v1372_v1, %v1371_v27  ;;  %v2688_v31 = vld [vmem:[%s2767_s21 + $0x1d8] sm:$0xff] }
 0x373   : > { %v1534_v20 = vrot.slane %v3970_v38, 4  ;;  %v1215_v3 = vpop.permute.xlu1 %1214  ;;  %v1185_v22 = vpop.permute.xlu0 %1184  ;;  %v1472_v42 = vadd.f32 %v1471_v54, %v1470_v30  ;;  %v1517_v2 = vadd.f32 %v1516_v37, %v1515_v59  ;;  %v1393_v18 = vrot.slane %v1392_v16, 4  ;;  %v2690_v7 = vld [vmem:[%s2767_s21 + $0x178] sm:$0xff] }
 0x374   : > { %4475 = vst [vmem:[#allocation35_spill] sm:$0xff] %v3984_v48  ;;  %v1560_v60 = vadd.f32 %v3869_v17, %v3984_v48  ;;  %v3997_v35 = vmul.f32 %v2687_v14, %v1215_v3  ;;  %v4000_v55 = vmul.f32 %v2688_v31, %v1215_v3  ;;  %v2689_v17 = vld [vmem:[%s2767_s21 + $0x170] sm:$0xff]  ;;  %v4006_v6 = vmul.f32 %v2690_v7, %v1185_v22 }
 0x375   : > { %v4003_v24 = vmul.f32 %v2689_v17, %v1185_v22  ;;  %v1374_v11 = vrot.slane %v1373_v26, 2  ;;  %v4008_v27 = vmul.f32 0.03125, %v1472_v42  ;;  %v1518_v30 = vrot.slane %v1517_v2, 1 }
 0x376   : > { %4477 = vst [vmem:[#allocation36_spill] sm:$0xff] %v3997_v35  ;;  %v1561_v59 = vrot.slane %v1560_v60, 4  ;;  %1346 = vst [vmem:[%s3683_s26 + $0x1d0] sm:$0xff] %v3997_v35  ;;  %v1607_v31 = vadd.f32 %v1606_v52, %v4006_v6  ;;  %v1699_v1 = vadd.f32 %v4000_v55, %v3955_v63  ;;  %v1394_v54 = vmax.f32 %v1392_v16, %v1393_v18  ;;  %v2692_v35 = vld [vmem:[%s2767_s21 + $0x1a8] sm:$0xff]  ;;  %v2693_v52 = vld [vmem:[%s2767_s21 + $0x1b0] sm:$0xff] }
 0x377   : > { %v1490_v37 = vmax.f32 %v1488_v58, %v1489_v25  ;;  %v1200_v3 = vpop.permute.xlu1 %1199  ;;  %v1204_v22 = vpop.permute.xlu0 %1203  ;;  %v1375_v14 = vadd.f32 %v1374_v11, %v1373_v26  ;;  %v1519_v42 = vadd.f32 %v1518_v30, %v1517_v2  ;;  %v1745_v7 = vrot.slane %v4008_v27, 6 }
 0x378   : > { %v1562_v17 = vadd.f32 %v1561_v59, %v1560_v60  ;;  %v4017_v32 = vmul.f32 %v2691_v5, %v1200_v3  ;;  %v4020_v57 = vmul.f32 %v2692_v35, %v1200_v3  ;;  %v4023_v40 = vmul.f32 %v2693_v52, %v1204_v22  ;;  %v2696_v52 = vld [vmem:[%s2767_s21 + $0x1e8] sm:$0xff] }
 0x379   : > { %v4026_v16 = vmul.f32 %v2694_v12, %v1204_v22  ;;  %v1376_v58 = vrot.slane %v1375_v14, 1  ;;  %v1521_v11 = vmul.f32 0.03125, %v1519_v42  ;;  %v1608_v26 = vrot.slane %v1607_v31, 4  ;;  %v2695_v12 = vld [vmem:[%s2767_s21 + $0x1e0] sm:$0xff] }
 0x37a   : > { %v1563_v2 = vrot.slane %v1562_v17, 2  ;;  %v1653_v60 = vadd.f32 %v3940_v56, %v4020_v57  ;;  %v1395_v5 = vrot.slane %v1394_v54, 2  ;;  %v1491_v25 = vrot.slane %v1490_v37, 1 }
 0x37b   : > { %v1535_v35 = vmax.f32 %v3970_v38, %v1534_v20  ;;  %v1219_v18 = vpop.permute.xlu1 %1218  ;;  %v1377_v27 = vadd.f32 %v1376_v58, %v1375_v14  ;;  %v1609_v59 = vadd.f32 %v1608_v26, %v1607_v31  ;;  %v1757_v3 = vrot.slane %v1521_v11, 5 }
 0x37c   : > { %v1564_v30 = vadd.f32 %v1563_v2, %v1562_v17  ;;  %v4032_v22 = vmul.f32 %v2695_v12, %v1219_v18  ;;  %v4035_v42 = vmul.f32 %v2696_v52, %v1219_v18  ;;  %v1654_v21 = vadd.f32 %v1653_v60, %v4026_v16 }
 0x37d   : > { %v1396_v56 = vmax.f32 %v1394_v54, %v1395_v5  ;;  %v1380_v51 = vmul.f32 0.03125, %v1377_v27  ;;  %v1610_v10 = vrot.slane %v1609_v59, 2  ;;  %v4038_v38 = vmax.f32 %v1490_v37, %v1491_v25  ;;  %v2697_v5 = vld [vmem:[%s2767_s21 + $0x1f0] sm:$0xff]  ;;  %v2698_v37 = vld [vmem:[%s2767_s21 + $0x1f8] sm:$0xff] }
 0x37e   : > { %4478 = vst [vmem:[#allocation37_spill] sm:$0xff] %v4035_v42  ;;  %v1565_v13 = vrot.slane %v1564_v30, 1  ;;  %v1655_v20 = vrot.slane %v1654_v21, 4  ;;  %v1700_v31 = vadd.f32 %v1699_v1, %v4035_v42  ;;  %v1536_v17 = vrot.slane %v1535_v35, 2 }
 0x37f   : > { %v1397_v14 = vrot.slane %v1396_v56, 1  ;;  %v1223_v58 = vpop.permute.xlu1 %1222  ;;  %v1611_v2 = vadd.f32 %v1610_v10, %v1609_v59  ;;  %v4479_v26 = vrot.slane %v3957_v44, 7  ;;  %v1579_v54 = vmax.f32 %v3775_v36, %v3984_v48 }
 0x380   : > { %v1566_v11 = vadd.f32 %v1565_v13, %v1564_v30  ;;  %v4047_v18 = vmul.f32 %v2697_v5, %v1223_v58  ;;  %v4050_v25 = vmul.f32 %v2698_v37, %v1223_v58  ;;  %v1656_v1 = vadd.f32 %v1655_v20, %v1654_v21 }
 0x381   : > { %v1814_v60 = vsel %vm1812_vm13, %v1380_v51, %v4479_v26  ;;  %v1612_v52 = vrot.slane %v1611_v2, 1  ;;  %v1398_v10 = vmax.f32 %v1396_v56, %v1397_v14  ;;  %v1537_v30 = vmax.f32 %v1535_v35, %v1536_v17 }
 0x382   : > { %4480 = vst [vmem:[#allocation38_spill] sm:$0xff] %v4050_v25  ;;  %v1818_v27 = vsel %vm986_vm11, %v1814_v60, %v1745_v7  ;;  %v1568_v12 = vmul.f32 0.03125, %v1566_v11  ;;  %v1657_v44 = vrot.slane %v1656_v1, 2  ;;  %v1701_v51 = vadd.f32 %v1700_v31, %v4050_v25 }
 0x383   : > { %v1823_v13 = vsel %vm1821_vm14, %v1818_v27, %v1757_v3  ;;  %v4481_v59 = vmax.f32 %v3772_v45, %v3843_v39  ;;  %v1613_v5 = vadd.f32 %v1612_v52, %v1611_v2  ;;  %v1625_v21 = vmax.f32 %v3839_v28, %v3978_v47 }
 0x384   : > { %v1769_v48 = vrot.slane %v1568_v12, 4  ;;  %v1626_v7 = vmax.f32 %v3853_v49, %v4006_v6  ;;  %v1658_v20 = vadd.f32 %v1657_v44, %v1656_v1  ;;  %v1702_v58 = vrot.slane %v1701_v51, 4 }
 0x385   : > { %v1580_v26 = vmax.f32 %v4481_v59, %v1579_v54  ;;  %v1538_v3 = vrot.slane %v1537_v30, 1  ;;  %v1615_v14 = vmul.f32 0.03125, %v1613_v5  ;;  %v1672_v17 = vmax.f32 %v3921_v33, %v4020_v57 }
 0x386   : > { %v1828_v31 = vsel %vm1826_vm15, %v1823_v13, %v1769_v48  ;;  %v1627_v35 = vmax.f32 %v1625_v21, %v1626_v7  ;;  %v1659_v11 = vrot.slane %v1658_v20, 1  ;;  %v1703_v2 = vadd.f32 %v1702_v58, %v1701_v51 }
 0x387   : > { %v1581_v56 = vrot.slane %v1580_v26, 4  ;;  %v1539_v60 = vmax.f32 %v1537_v30, %v1538_v3  ;;  %v1781_v37 = vrot.slane %v1615_v14, 3  ;;  %v1673_v1 = vmax.f32 %v3913_v61, %v4026_v16 }
 0x388   : > { %v1628_v27 = vrot.slane %v1627_v35, 4  ;;  %v1719_v12 = vmax.f32 %v3955_v63, %v4035_v42  ;;  %v1660_v52 = vadd.f32 %v1659_v11, %v1658_v20  ;;  %v1704_v44 = vrot.slane %v1703_v2, 2 }
 0x389   : > { %v1582_v54 = vmax.f32 %v1580_v26, %v1581_v56  ;;  %v1720_v13 = vmax.f32 %v4000_v55, %v4050_v25  ;;  %v1833_v59 = vsel %vm1831_vm0, %v1828_v31, %v1781_v37  ;;  %v1674_v30 = vmax.f32 %v1672_v17, %v1673_v1 }
 0x38a   : > { %v1629_v51 = vmax.f32 %v1627_v35, %v1628_v27  ;;  %v1747_v26 = vrot.slane %v4038_v38, 6  ;;  %v1662_v5 = vmul.f32 0.03125, %v1660_v52  ;;  %v1705_v21 = vadd.f32 %v1704_v44, %v1703_v2 }
 0x38b   : > { %v1583_v48 = vrot.slane %v1582_v54, 2  ;;  %v1721_v58 = vmax.f32 %v1719_v12, %v1720_v13  ;;  %v1675_v56 = vrot.slane %v1674_v30, 4  ;;  %v1759_v20 = vrot.slane %v1539_v60, 5 }
 0x38c   : > { %v1630_v3 = vrot.slane %v1629_v51, 2  ;;  %v4482_v14 = vrot.slane %v3959_v34, 7  ;;  %v1706_v25 = vrot.slane %v1705_v21, 1  ;;  %v1793_v42 = vrot.slane %v1662_v5, 2  ;;  %v4081_v34 = vld [vmem:[%s3683_s26 + $0xb0] sm:$0xff] }
 0x38d   : > { %v1584_v7 = vmax.f32 %v1582_v54, %v1583_v48  ;;  %v1722_v37 = vrot.slane %v1721_v58, 4  ;;  %v1676_v17 = vmax.f32 %v1674_v30, %v1675_v56  ;;  %v1362_v2 = vadd.f32 %v3858_v53, %v3946_v9  ;;  %v4090_v5 = vld [vmem:[%s3683_s26 + $0xf0] sm:$0xff] }
 0x38e   : > { %v1816_v11 = vsel %vm1812_vm13, %v1398_v10, %v4482_v14  ;;  %v1631_v35 = vmax.f32 %v1629_v51, %v1630_v3  ;;  %v1707_v54 = vadd.f32 %v1706_v25, %v1705_v21  ;;  %v1838_v27 = vsel %vm1836_vm1, %v1833_v59, %v1793_v42 }
 0x38f   : > { %v1585_v31 = vrot.slane %v1584_v7, 1  ;;  %v1820_v38 = vsel %vm986_vm11, %v1816_v11, %v1747_v26  ;;  %v1723_v1 = vmax.f32 %v1721_v58, %v1722_v37  ;;  %v1677_v12 = vrot.slane %v1676_v17, 2 }
 0x390   : > { %v1632_v10 = vrot.slane %v1631_v35, 1  ;;  %v1825_v52 = vsel %vm1821_vm14, %v1820_v38, %v1759_v20  ;;  %v1363_v44 = vrot.slane %v1362_v2, 4  ;;  %v1709_v48 = vmul.f32 0.03125, %v1707_v54 }
 0x391   : > { %v1586_v60 = vmax.f32 %v1584_v7, %v1585_v31  ;;  %v1724_v13 = vrot.slane %v1723_v1, 2  ;;  %v4483_v53 = vrot.slane %v3906_v23, 4  ;;  %v1678_v42 = vmax.f32 %v1676_v17, %v1677_v12  ;;  %v4100_v17 = vld [vmem:[%s3683_s26 + $0x140] sm:$0xff] }
 0x392   : > { %v1633_v30 = vmax.f32 %v1631_v35, %v1632_v10  ;;  %v1364_v59 = vadd.f32 %v1363_v44, %v1362_v2  ;;  %v1457_v26 = vadd.f32 %v4081_v34, %v3861_v41  ;;  %v1805_v21 = vrot.slane %v1709_v48, 1  ;;  %v4109_v44 = vld [vmem:[%s3683_s26 + $0x160] sm:$0xff] }
 0x393   : > { %v1771_v51 = vrot.slane %v1586_v60, 4  ;;  %v1412_v25 = vadd.f32 %v4483_v53, %v3906_v23  ;;  %v1725_v7 = vmax.f32 %v1723_v1, %v1724_v13  ;;  %v1679_v56 = vrot.slane %v1678_v42, 1  ;;  %v4094_v23 = vld [vmem:[%s3683_s26 + $0x120] sm:$0xff] }
 0x394   : > { %v1783_v20 = vrot.slane %v1633_v30, 3  ;;  %v1365_v14 = vrot.slane %v1364_v59, 2  ;;  %v1458_v11 = vrot.slane %v1457_v26, 4  ;;  %v1843_v31 = vsel %vm1841_vm2, %v1838_v27, %v1805_v21 }
 0x395   : > { %v1830_v58 = vsel %vm1826_vm15, %v1825_v52, %v1771_v51  ;;  %v1413_v3 = vrot.slane %v1412_v25, 2  ;;  %v1726_v37 = vrot.slane %v1725_v7, 1  ;;  %v1504_v41 = vadd.f32 %v4090_v5, %v3893_v19  ;;  %2038 = vmatprep.mubr.f32.mxu1 %v1843_v31  ;;  %v4106_v52 = vld [vmem:[%s3683_s26 + $0x150] sm:$0xff] }
 0x396   : > { %v1680_v38 = vmax.f32 %v1678_v42, %v1679_v56  ;;  %v1835_v2 = vsel %vm1831_vm0, %v1830_v58, %v1783_v20  ;;  %v1366_v54 = vadd.f32 %v1365_v14, %v1364_v59  ;;  %v1459_v60 = vadd.f32 %v1458_v11, %v1457_v26  ;;  %v4115_v59 = vld [vmem:[%s3683_s26 + $0x180] sm:$0xff]  ;;  %v4120_v58 = vld [vmem:[%s3683_s26 + $0x1d0] sm:$0xff] }
 0x397   : > { %v1414_v35 = vadd.f32 %v1413_v3, %v1412_v25  ;;  %v1727_v1 = vmax.f32 %v1725_v7, %v1726_v37  ;;  %v1505_v12 = vrot.slane %v1504_v41, 4  ;;  %v1550_v27 = vadd.f32 %v4094_v23, %v3910_v43  ;;  %v4124_v11 = vld [vmem:[%s3683_s26 + $0x190] sm:$0xff] }
 0x398   : > { %v1795_v19 = vrot.slane %v1680_v38, 2  ;;  %v1367_v48 = vrot.slane %v1366_v54, 1  ;;  %v1460_v13 = vrot.slane %v1459_v60, 2  ;;  %v1596_v51 = vadd.f32 %v4106_v52, %v4100_v17  ;;  %v4130_v38 = vld [vmem:[%s3683_s26 + $0x1c0] sm:$0xff] }
 0x399   : > { %v1415_v10 = vrot.slane %v1414_v35, 1  ;;  %v1807_v53 = vrot.slane %v1727_v1, 1  ;;  %v1506_v30 = vadd.f32 %v1505_v12, %v1504_v41  ;;  %v1551_v42 = vadd.f32 %v1550_v27, %v3981_v4 }
 0x39a   : > { %v1840_v43 = vsel %vm1836_vm1, %v1835_v2, %v1795_v19  ;;  %v1368_v26 = vadd.f32 %v1367_v48, %v1366_v54  ;;  %v1461_v21 = vadd.f32 %v1460_v13, %v1459_v60  ;;  %v1597_v7 = vadd.f32 %v4109_v44, %v1596_v51 }
 0x39b   : > { %v1416_v25 = vadd.f32 %v1415_v10, %v1414_v35  ;;  %v1845_v3 = vsel %vm1841_vm2, %v1840_v43, %v1807_v53  ;;  %v1507_v20 = vrot.slane %v1506_v30, 2  ;;  %v1552_v14 = vrot.slane %v1551_v42, 4 }
 0x39c   : > { %2109 = vmatprep.mubr.f32.mxu0 %v1845_v3  ;;  %v1379_v31 = vmul.f32 0.03125, %v1368_v26  ;;  %v1462_v37 = vrot.slane %v1461_v21, 1  ;;  %v1598_v35 = vadd.f32 %v1597_v7, %v4003_v24  ;;  %v1643_v41 = vadd.f32 %v4124_v11, %v4115_v59 }
 0x39d   : > { %v1426_v56 = vmul.f32 0.03125, %v1416_v25  ;;  %v1508_v2 = vadd.f32 %v1507_v20, %v1506_v30  ;;  %v1553_v54 = vadd.f32 %v1552_v14, %v1551_v42  ;;  %v1690_v60 = vadd.f32 %v4120_v58, %v4130_v38 }
 0x39e   : > { %v1463_v10 = vadd.f32 %v1462_v37, %v1461_v21  ;;  %v1599_v12 = vrot.slane %v1598_v35, 4  ;;  %v1644_v27 = vadd.f32 %v1643_v41, %v4017_v32  ;;  %v1382_v19 = vmax.f32 %v3792_v46, %v3946_v9 }
 0x39f   : > { %v1732_v1 = vrot.slane %v1426_v56, 7  ;;  %v1509_v48 = vrot.slane %v1508_v2, 1  ;;  %v1554_v13 = vrot.slane %v1553_v54, 2  ;;  %v1691_v51 = vadd.f32 %v1690_v60, %v4032_v22 }
 0x3a0   : > { %v1473_v25 = vmul.f32 0.03125, %v1463_v10  ;;  %v1600_v30 = vadd.f32 %v1599_v12, %v1598_v35  ;;  %v1645_v42 = vadd.f32 %v1644_v27, %v4023_v40  ;;  %v4484_v43 = vmax.f32 %v3817_v8, %v3830_v15  ;;  %v4487_v10 = vld [vmem:[#allocation24_spill] sm:$0xff]  ;;  %v4488_v12 = vld [vmem:[#allocation21_spill] sm:$0xff] }
 0x3a1   : > { %v1813_v53 = vsel %vm1812_vm13, %v1379_v31, %v1732_v1  ;;  %v1510_v21 = vadd.f32 %v1509_v48, %v1508_v2  ;;  %v1555_v7 = vadd.f32 %v1554_v13, %v1553_v54  ;;  %v1692_v3 = vadd.f32 %v1691_v51, %v4047_v18  ;;  %v4489_v51 = vld [vmem:[#allocation16_spill] sm:$0xff] }
 0x3a2   : > { %v1383_v26 = vmax.f32 %v4484_v43, %v1382_v19  ;;  %v4485_v46 = vmax.f32 %v3736_v0, %v3890_v62  ;;  %v4486_v56 = vmax.f32 %v3733_v29, %v3764_v50  ;;  %v1601_v14 = vrot.slane %v1600_v30, 2 }
 0x3a3   : > { %v1646_v31 = vrot.slane %v1645_v42, 4  ;;  %v1744_v37 = vrot.slane %v1473_v25, 6  ;;  %v1520_v41 = vmul.f32 0.03125, %v1510_v21  ;;  %v1556_v60 = vrot.slane %v1555_v7, 1 }
 0x3a4   : > { %v1430_v20 = vmax.f32 %v4486_v56, %v4485_v46  ;;  %v1384_v35 = vrot.slane %v1383_v26, 4  ;;  %v1693_v1 = vrot.slane %v1692_v3, 4  ;;  %v1602_v15 = vadd.f32 %v1601_v14, %v1600_v30  ;;  %v4490_v14 = vld [vmem:[#allocation20_spill] sm:$0xff] }
 0x3a5   : > { %v1647_v2 = vadd.f32 %v1646_v31, %v1645_v42  ;;  %v1522_v27 = vmax.f32 %v4488_v12, %v4487_v10  ;;  %v1557_v19 = vadd.f32 %v1556_v60, %v1555_v7  ;;  %v1756_v62 = vrot.slane %v1520_v41, 5  ;;  %v4491_v7 = vld [vmem:[#allocation22_spill] sm:$0xff] }
 0x3a6   : > { %v1431_v8 = vrot.slane %v1430_v20, 4  ;;  %v1385_v54 = vmax.f32 %v1383_v26, %v1384_v35  ;;  %v1694_v0 = vadd.f32 %v1693_v1, %v1692_v3  ;;  %v1603_v29 = vrot.slane %v1602_v15, 1 }
 0x3a7   : > { %v1648_v50 = vrot.slane %v1647_v2, 2  ;;  %v1817_v13 = vsel %vm986_vm11, %v1813_v53, %v1744_v37  ;;  %v1476_v25 = vmax.f32 %v4489_v51, %v4081_v34  ;;  %v1567_v43 = vmul.f32 0.03125, %v1557_v19  ;;  %v4493_v53 = vld [vmem:[#allocation23_spill] sm:$0xff] }
 0x3a8   : > { %v1432_v48 = vmax.f32 %v1430_v20, %v1431_v8  ;;  %v1695_v21 = vrot.slane %v1694_v0, 2  ;;  %v1386_v46 = vrot.slane %v1385_v54, 2  ;;  %v1604_v42 = vadd.f32 %v1603_v29, %v1602_v15 }
 0x3a9   : > { %v1649_v26 = vadd.f32 %v1648_v50, %v1647_v2  ;;  %v1822_v56 = vsel %vm1821_vm14, %v1817_v13, %v1756_v62  ;;  %v4492_v3 = vmax.f32 %v4490_v14, %v4491_v7  ;;  %v1768_v35 = vrot.slane %v1567_v43, 4  ;;  %v4495_v43 = vld [vmem:[#allocation25_spill] sm:$0xff] }
 0x3aa   : > { %v1433_v30 = vrot.slane %v1432_v48, 2  ;;  %v1696_v20 = vadd.f32 %v1695_v21, %v1694_v0  ;;  %v1523_v37 = vmax.f32 %v4493_v53, %v4090_v5  ;;  %v1614_v60 = vmul.f32 0.03125, %v1604_v42  ;;  %v4494_v0 = vld [vmem:[#allocation28_spill] sm:$0xff] }
 0x3ab   : > { %v1477_v31 = vmax.f32 %v4492_v3, %v1476_v25  ;;  %v1650_v34 = vrot.slane %v1649_v26, 1  ;;  %v1387_v10 = vmax.f32 %v1385_v54, %v1386_v46  ;;  %v1827_v19 = vsel %vm1826_vm15, %v1822_v56, %v1768_v35 }
 0x3ac   : > { %v1434_v41 = vmax.f32 %v1432_v48, %v1433_v30  ;;  %v1697_v8 = vrot.slane %v1696_v20, 1  ;;  %v1524_v12 = vmax.f32 %v1522_v27, %v1523_v37  ;;  %v1780_v2 = vrot.slane %v1614_v60, 3 }
 0x3ad   : > { %v1478_v1 = vrot.slane %v1477_v31, 4  ;;  %v1651_v15 = vadd.f32 %v1650_v34, %v1649_v26  ;;  %v1569_v48 = vmax.f32 %v4494_v0, %v4094_v23  ;;  %v1570_v21 = vmax.f32 %v4495_v43, %v3981_v4 }
 0x3ae   : > { %v1698_v29 = vadd.f32 %v1697_v8, %v1696_v20  ;;  %v1435_v50 = vrot.slane %v1434_v41, 1  ;;  %v1525_v13 = vrot.slane %v1524_v12, 4  ;;  %v1832_v5 = vsel %vm1831_vm0, %v1827_v19, %v1780_v2 }
 0x3af   : > { %v1479_v62 = vmax.f32 %v1477_v31, %v1478_v1  ;;  %v1661_v51 = vmul.f32 0.03125, %v1651_v15  ;;  %v1616_v46 = vmax.f32 %v4100_v17, %v4109_v44  ;;  %v1617_v30 = vmax.f32 %v4106_v52, %v4003_v24 }
 0x3b0   : > { %v1708_v54 = vmul.f32 0.03125, %v1698_v29  ;;  %v1526_v27 = vmax.f32 %v1524_v12, %v1525_v13  ;;  %v1571_v56 = vmax.f32 %v1569_v48, %v1570_v21  ;;  %v1663_v23 = vmax.f32 %v4115_v59, %v4017_v32 }
 0x3b1   : > { %v1480_v25 = vrot.slane %v1479_v62, 2  ;;  %v1792_v42 = vrot.slane %v1661_v51, 2  ;;  %v1618_v3 = vmax.f32 %v1616_v46, %v1617_v30  ;;  %v1664_v31 = vmax.f32 %v4124_v11, %v4023_v40 }
 0x3b2   : > { %v1804_v14 = vrot.slane %v1708_v54, 1  ;;  %v1527_v7 = vrot.slane %v1526_v27, 2  ;;  %v1388_v35 = vrot.slane %v1387_v10, 1  ;;  %v1572_v17 = vrot.slane %v1571_v56, 4 }
 0x3b3   : > { %v1481_v26 = vmax.f32 %v1479_v62, %v1480_v25  ;;  %v1837_v20 = vsel %vm1836_vm1, %v1832_v5, %v1792_v42  ;;  %v1619_v37 = vrot.slane %v1618_v3, 4  ;;  %v1665_v60 = vmax.f32 %v1663_v23, %v1664_v31 }
 0x3b4   : > { %v1842_v44 = vsel %vm1841_vm2, %v1837_v20, %v1804_v14  ;;  %v1528_v52 = vmax.f32 %v1526_v27, %v1527_v7  ;;  %v1436_v34 = vmax.f32 %v1434_v41, %v1435_v50  ;;  %v1573_v1 = vmax.f32 %v1571_v56, %v1572_v17 }
 0x3b5   : > { %v1482_v53 = vrot.slane %v1481_v26, 1  ;;  %2039 = vmatmul.mubr.f32.vlgmr.msra.gmra.mxu1 %v1842_v44  ;;  %v1710_v59 = vmax.f32 %v4130_v38, %v4032_v22  ;;  %v1711_v8 = vmax.f32 %v4120_v58, %v4047_v18  ;;  %v1620_v15 = vmax.f32 %v1618_v3, %v1619_v37 }
 0x3b6   : > { %v1529_v12 = vrot.slane %v1528_v52, 1  ;;  %v1666_v2 = vrot.slane %v1665_v60, 4  ;;  %v1389_v19 = vmax.f32 %v1387_v10, %v1388_v35  ;;  %v1574_v62 = vrot.slane %v1573_v1, 2 }
 0x3b7   : > { %v1483_v11 = vmax.f32 %v1481_v26, %v1482_v53  ;;  %v1712_v29 = vmax.f32 %v1710_v59, %v1711_v8  ;;  %v1621_v0 = vrot.slane %v1620_v15, 2  ;;  %v1734_v41 = vrot.slane %v1436_v34, 7 }
 0x3b8   : > { %v1530_v13 = vmax.f32 %v1528_v52, %v1529_v12  ;;  %v1667_v48 = vmax.f32 %v1665_v60, %v1666_v2  ;;  %v1575_v51 = vmax.f32 %v1573_v1, %v1574_v62 }
 0x3b9   : > { %v1713_v5 = vrot.slane %v1712_v29, 4  ;;  %v1622_v50 = vmax.f32 %v1620_v15, %v1621_v0  ;;  %v1746_v43 = vrot.slane %v1483_v11, 6  ;;  %v1815_v58 = vsel %vm1812_vm13, %v1389_v19, %v1734_v41  ;;  %v4496_v41 = vld [vmem:[#allocation2_spill] sm:$0xff] }
 0x3ba   : > { %v1668_v25 = vrot.slane %v1667_v48, 2  ;;  %v1576_v38 = vrot.slane %v1575_v51, 1  ;;  %v1758_v54 = vrot.slane %v1530_v13, 5  ;;  %v2725_v0 = vmov 1966171168  }
 0x3bb   : > { %v1714_v21 = vmax.f32 %v1712_v29, %v1713_v5  ;;  %v1623_v27 = vrot.slane %v1622_v50, 1  ;;  %v1819_v56 = vsel %vm986_vm11, %v1815_v58, %v1746_v43 }
 0x3bc   : > { %v1669_v46 = vmax.f32 %v1667_v48, %v1668_v25  ;;  %v1577_v30 = vmax.f32 %v1575_v51, %v1576_v38  ;;  %v1824_v7 = vsel %vm1821_vm14, %v1819_v56, %v1758_v54  ;;  %v2197_v48 = vunpack.c.l.s4 %v2725_v0 }
 0x3bd   : > { %v1715_v10 = vrot.slane %v1714_v21, 2  ;;  %v1624_v42 = vmax.f32 %v1622_v50, %v1623_v27 }
 0x3be   : > { %v1670_v26 = vrot.slane %v1669_v46, 1  ;;  %v1770_v14 = vrot.slane %v1577_v30, 4  ;;  %v2198_v51 = vunpack.c.0.s8 %v2197_v48  ;;  %v4500_v48 = vld [vmem:[#allocation10_spill] sm:$0xff] }
 0x3bf   : > { %v1716_v23 = vmax.f32 %v1714_v21, %v1715_v10  ;;  %v1782_v31 = vrot.slane %v1624_v42, 3 }
 0x3c0   : > { %v1671_v3 = vmax.f32 %v1669_v46, %v1670_v26  ;;  %v1829_v53 = vsel %vm1826_vm15, %v1824_v7, %v1770_v14  ;;  %v2201_v50 = vsub.s32 %v2198_v51, %v4496_v41  ;;  %v4498_v7 = vld [vmem:[#allocation3_spill] sm:$0xff] }
 0x3c1   : > { %v1717_v20 = vrot.slane %v1716_v23, 1  ;;  %v1834_v44 = vsel %vm1831_vm0, %v1829_v53, %v1782_v31 }
 0x3c2   : > { %v1794_v35 = vrot.slane %v1671_v3, 2 }
 0x3c3   : > { %v1718_v17 = vmax.f32 %v1716_v23, %v1717_v20  ;;  %v4497_v23 = vld [vmem:[#allocation4_spill] sm:$0xff] }
 0x3c4   : > { %v1839_v37 = vsel %vm1836_vm1, %v1834_v44, %v1794_v35 }
 0x3c5   : > { %v1806_v52 = vrot.slane %v1718_v17, 1 }
 0x3c7   : > { %v1844_v60 = vsel %vm1841_vm2, %v1839_v37, %v1806_v52 }
 0x3c8   : > { %2110 = vmatmul.mubr.f32.vlgmr.msra.gmra.mxu0 %v1844_v60 }
 0x475   : > { %v2040_v34 = vpop.f32.mrf.mxu1 }
 0x477   : > { %v2042_v59 = vpop.f32.mrf.mxu1 }
 0x488   : > { %v2111_v1 = vpop.f32.mrf.mxu0 }
 0x489   : > { %v2112_v8 = vadd.f32 %v2111_v1, %v2040_v34 }
 0x48a   : > { %v2113_v11 = vpop.f32.mrf.mxu0 }
 0x48b   : > { %v2583_v12 = vmul.f32 -1.442695, %v2112_v8  ;;  %v2114_v15 = vadd.f32 %v2113_v11, %v2042_v59 }
 0x48d   : > { %2627 = vpow2.f32 %v2583_v12  ;;  %v2584_v2 = vmul.f32 -1.442695, %v2114_v15 }
 0x48f   : > { %2629 = vpow2.f32 %v2584_v2  ;;  %v2699_v2 = vld [vmem:[%s3683_s26] sm:$0xff] }
 0x49a   : > { %v2628_v19 = vpop.eup %2627 }
 0x49b   : > { %v2122_v62 = vadd.f32 1.0, %v2628_v19 }
 0x49c   : > { %v2630_v29 = vpop.eup %2629 }
 0x49d   : > { %v2123_v13 = vadd.f32 1.0, %v2630_v29  ;;  %2631 = vrcp.f32 %v2122_v62  ;;  %v4499_v62 = vld [vmem:[#allocation12_spill] sm:$0xff] }
 0x49f   : > { %2633 = vrcp.f32 %v2123_v13  ;;  %v2700_v13 = vld [vmem:[%s3683_s26 + $0x10] sm:$0xff] }
 0x4aa   : > { %v2632_v5 = vpop.eup %2631 }
 0x4ac   : > { %v2634_v25 = vpop.eup %2633 }
 0x4ad   : > { %v2194_v43 = vcombine.low %v2632_v5, %v2634_v25  ;;  %v2195_v38 = vcombine.high %v2632_v5, %v2634_v25  ;;  %v2701_v5 = vld [vmem:[%s3683_s26 + $0x20] sm:$0xff] }
 0x4af   : > { %v2202_v21 = vrot.slane %v2194_v43, %v2201_v50  ;;  %v2209_v54 = vrot.slane %v2195_v38, %v2201_v50  ;;  %v4502_v38 = vld [vmem:[#allocation32_spill] sm:$0xff] }
 0x4b1   : > { %v2210_v58 = vcombine.high %v2202_v21, %v2202_v21  ;;  %v2211_v27 = vcombine.high %v2209_v54, %v2209_v54  ;;  %v2218_v46 = vrot.slane %v2202_v21, %v2201_v50  ;;  %v2225_v30 = vrot.slane %v2209_v54, %v2201_v50  ;;  %v2702_v54 = vld [vmem:[%s3683_s26 + $0x40] sm:$0xff] }
 0x4b3   : > { %v2232_v10 = vrot.slane %v2210_v58, %v2201_v50  ;;  %v2239_v42 = vrot.slane %v2211_v27, %v2201_v50  ;;  %v2240_v26 = vcombine.high %v2218_v46, %v2218_v46  ;;  %v2241_v56 = vcombine.high %v2225_v30, %v2225_v30  ;;  %v4501_v50 = vld [vmem:[#allocation13_spill] sm:$0xff]  ;;  %v4503_v27 = vld [vmem:[#allocation6_spill] sm:$0xff] }
 0x4b4   : > { %v2247_v14 = vrot.slane %v2218_v46, %v4497_v23  ;;  %v2251_v3 = vrot.slane %v2218_v46, %v4498_v7  ;;  %v4192_v31 = vrot.slane %v2225_v30, %v4497_v23  ;;  %v4195_v20 = vrot.slane %v2225_v30, %v4498_v7  ;;  %v2703_v30 = vld [vmem:[%s3683_s26 + $0x50] sm:$0xff] }
 0x4b5   : > { %v2242_v35 = vcombine.high %v2232_v10, %v2232_v10  ;;  %v2243_v53 = vcombine.high %v2239_v42, %v2239_v42  ;;  %v2255_v17 = vrot.slane %v2232_v10, %v4497_v23  ;;  %v2259_v44 = vrot.slane %v2232_v10, %v4498_v7 }
 0x4b6   : > { %v2263_v52 = vrot.slane %v2240_v26, %v4497_v23  ;;  %v2267_v37 = vrot.slane %v2240_v26, %v4498_v7  ;;  %v4202_v60 = vrot.slane %v2239_v42, %v4497_v23  ;;  %v4205_v34 = vrot.slane %v2239_v42, %v4498_v7  ;;  %v4504_v42 = vld [vmem:[#allocation5_spill] sm:$0xff] }
 0x4b7   : > { %v4208_v1 = vrot.slane %v2242_v35, %v4497_v23  ;;  %v4211_v59 = vrot.slane %v2242_v35, %v4498_v7  ;;  %v4214_v8 = vrot.slane %v2241_v56, %v4497_v23  ;;  %v4217_v11 = vrot.slane %v2241_v56, %v4498_v7  ;;  %v2704_v56 = vld [vmem:[%s3683_s26 + $0x60] sm:$0xff]  ;;  %v4507_v35 = vld [vmem:[#allocation19_spill] sm:$0xff] }
 0x4b8   : > { %v4220_v12 = vrot.slane %v2243_v53, %v4497_v23  ;;  %v4223_v15 = vrot.slane %v2243_v53, %v4498_v7  ;;  %v2324_v19 = vmul.f32 %v2699_v2, %v2247_v14  ;;  %v2325_v29 = vmul.f32 %v2251_v3, %v4499_v62  ;;  %v4505_v23 = vld [vmem:[#allocation8_spill] sm:$0xff]  ;;  %v4506_v7 = vld [vmem:[#allocation18_spill] sm:$0xff]  ;;  %v4508_v62 = vld [vmem:[#allocation9_spill] sm:$0xff] }
 0x4b9   : > { %v2326_v0 = vmul.f32 %v2700_v13, %v2247_v14  ;;  %v2327_v51 = vmul.f32 %v2251_v3, %v4500_v48  ;;  %v2328_v41 = vmul.f32 %v2701_v5, %v2247_v14  ;;  %v2329_v25 = vmul.f32 %v2251_v3, %v4501_v50  ;;  %v2705_v2 = vld [vmem:[%s3683_s26 + $0x80] sm:$0xff]  ;;  %v2706_v13 = vld [vmem:[%s3683_s26 + $0x90] sm:$0xff]  ;;  %v4509_v48 = vld [vmem:[#allocation7_spill] sm:$0xff] }
 0x4ba   : > { %v2330_v43 = vmul.f32 %v2247_v14, %v3946_v9  ;;  %v2331_v21 = vmul.f32 %v2251_v3, %v4502_v38  ;;  %v2332_v58 = vmul.f32 %v2702_v54, %v2255_v17  ;;  %v2333_v46 = vmul.f32 %v2259_v44, %v4503_v27  ;;  %2388 = vst [vmem:[%s3683_s26] sm:$0xff] %v2324_v19  ;;  %v4510_v5 = vld [vmem:[#allocation15_spill] sm:$0xff]  ;;  %v4511_v50 = vld [vmem:[#allocation26_spill] sm:$0xff] }
 0x4bb   : > { %2389 = vst [vmem:[%s3683_s26 + $0x8] sm:$0xff] %v2325_v29  ;;  %v2334_v10 = vmul.f32 %v2703_v30, %v2255_v17  ;;  %v2335_v26 = vmul.f32 %v2259_v44, %v4504_v42  ;;  %v2336_v9 = vmul.f32 %v2704_v56, %v2255_v17  ;;  %v2337_v14 = vmul.f32 %v2259_v44, %v4505_v23  ;;  %v4514_v30 = vld [vmem:[#allocation14_spill] sm:$0xff] }
 0x4bc   : > { %2390 = vst [vmem:[%s3683_s26 + $0x10] sm:$0xff] %v2326_v0  ;;  %2391 = vst [vmem:[%s3683_s26 + $0x18] sm:$0xff] %v2327_v51  ;;  %v2338_v3 = vmul.f32 %v2255_v17, %v4506_v7  ;;  %v2339_v53 = vmul.f32 %v2259_v44, %v4507_v35  ;;  %v2340_v19 = vmul.f32 %v2705_v2, %v2263_v52  ;;  %v2707_v44 = vld [vmem:[%s3683_s26 + $0xa0] sm:$0xff]  ;;  %v2712_v2 = vld [vmem:[%s3683_s26 + $0x110] sm:$0xff] }
 0x4bd   : > { %2392 = vst [vmem:[%s3683_s26 + $0x20] sm:$0xff] %v2328_v41  ;;  %2393 = vst [vmem:[%s3683_s26 + $0x28] sm:$0xff] %v2329_v25  ;;  %v2341_v29 = vmul.f32 %v2267_v37, %v4508_v62  ;;  %v2342_v0 = vmul.f32 %v2706_v13, %v2263_v52  ;;  %v2343_v17 = vmul.f32 %v2267_v37, %v4509_v48  ;;  %v4518_v13 = vld [vmem:[#allocation35_spill] sm:$0xff] }
 0x4be   : > { %2394 = vst [vmem:[%s3683_s26 + $0x30] sm:$0xff] %v2330_v43  ;;  %2395 = vst [vmem:[%s3683_s26 + $0x38] sm:$0xff] %v2331_v21  ;;  %v2344_v51 = vmul.f32 %v2707_v44, %v2263_v52  ;;  %v2345_v41 = vmul.f32 %v2267_v37, %v4510_v5  ;;  %v2346_v25 = vmul.f32 %v2263_v52, %v4511_v50  ;;  %v4512_v43 = vld [vmem:[#allocation27_spill] sm:$0xff]  ;;  %v2708_v21 = vld [vmem:[%s3683_s26 + $0xc0] sm:$0xff] }
 0x4bf   : > { %2396 = vst [vmem:[%s3683_s26 + $0x40] sm:$0xff] %v2332_v58  ;;  %2397 = vst [vmem:[%s3683_s26 + $0x48] sm:$0xff] %v2333_v46  ;;  %v2347_v38 = vmul.f32 %v2267_v37, %v4512_v43  ;;  %v2348_v54 = vmul.f32 %v2708_v21, %v4208_v1  ;;  %v4513_v58 = vld [vmem:[#allocation11_spill] sm:$0xff]  ;;  %v2709_v46 = vld [vmem:[%s3683_s26 + $0xd0] sm:$0xff]  ;;  %v2351_v37 = vmul.f32 %v4211_v59, %v4514_v30 }
 0x4c0   : > { %2398 = vst [vmem:[%s3683_s26 + $0x50] sm:$0xff] %v2334_v10  ;;  %2399 = vst [vmem:[%s3683_s26 + $0x58] sm:$0xff] %v2335_v26  ;;  %v2349_v27 = vmul.f32 %v4211_v59, %v4513_v58  ;;  %v2350_v52 = vmul.f32 %v2709_v46, %v4208_v1  ;;  %v2710_v10 = vld [vmem:[%s3683_s26 + $0xe0] sm:$0xff]  ;;  %v4515_v26 = vld [vmem:[#allocation17_spill] sm:$0xff] }
 0x4c1   : > { %2400 = vst [vmem:[%s3683_s26 + $0x60] sm:$0xff] %v2336_v9  ;;  %2401 = vst [vmem:[%s3683_s26 + $0x68] sm:$0xff] %v2337_v14  ;;  %v2352_v42 = vmul.f32 %v2710_v10, %v4208_v1  ;;  %v2353_v56 = vmul.f32 %v4211_v59, %v4515_v26  ;;  %v4516_v9 = vld [vmem:[#allocation30_spill] sm:$0xff]  ;;  %v4517_v14 = vld [vmem:[#allocation31_spill] sm:$0xff] }
 0x4c2   : > { %2402 = vst [vmem:[%s3683_s26 + $0x70] sm:$0xff] %v2338_v3  ;;  %2403 = vst [vmem:[%s3683_s26 + $0x78] sm:$0xff] %v2339_v53  ;;  %v2354_v23 = vmul.f32 %v4208_v1, %v4516_v9  ;;  %v2355_v7 = vmul.f32 %v4211_v59, %v4517_v14  ;;  %v2711_v3 = vld [vmem:[%s3683_s26 + $0x100] sm:$0xff]  ;;  %v2357_v53 = vmul.f32 %v4195_v20, %v3772_v45  ;;  %v4520_v5 = vld [vmem:[#allocation29_spill] sm:$0xff] }
 0x4c3   : > { %2404 = vst [vmem:[%s3683_s26 + $0x80] sm:$0xff] %v2340_v19  ;;  %2405 = vst [vmem:[%s3683_s26 + $0x88] sm:$0xff] %v2341_v29  ;;  %v2356_v35 = vmul.f32 %v2711_v3, %v4192_v31  ;;  %v2358_v1 = vmul.f32 %v2712_v2, %v4192_v31  ;;  %v2359_v59 = vmul.f32 %v4195_v20, %v3775_v36  ;;  %v2713_v19 = vld [vmem:[%s3683_s26 + $0x120] sm:$0xff]  ;;  %v2716_v50 = vld [vmem:[%s3683_s26 + $0x190] sm:$0xff] }
 0x4c4   : > { %2406 = vst [vmem:[%s3683_s26 + $0x90] sm:$0xff] %v2342_v0  ;;  %2407 = vst [vmem:[%s3683_s26 + $0x98] sm:$0xff] %v2343_v17  ;;  %v2360_v62 = vmul.f32 %v2713_v19, %v4192_v31  ;;  %v2361_v45 = vmul.f32 %v4195_v20, %v3843_v39  ;;  %v2362_v29 = vmul.f32 %v4192_v31, %v3981_v4  ;;  %v2714_v0 = vld [vmem:[%s3683_s26 + $0x140] sm:$0xff]  ;;  %v2715_v17 = vld [vmem:[%s3683_s26 + $0x150] sm:$0xff] }
 0x4c5   : > { %2408 = vst [vmem:[%s3683_s26 + $0xa0] sm:$0xff] %v2344_v51  ;;  %2409 = vst [vmem:[%s3683_s26 + $0xa8] sm:$0xff] %v2345_v41  ;;  %v2363_v36 = vmul.f32 %v4195_v20, %v4518_v13  ;;  %v2364_v48 = vmul.f32 %v2714_v0, %v4202_v60  ;;  %v2365_v39 = vmul.f32 %v4205_v34, %v3839_v28  ;;  %v4519_v20 = vld [vmem:[#allocation34_spill] sm:$0xff]  ;;  %v4522_v43 = vld [vmem:[#allocation36_spill] sm:$0xff] }
 0x4c6   : > { %2410 = vst [vmem:[%s3683_s26 + $0xb0] sm:$0xff] %v2346_v25  ;;  %2411 = vst [vmem:[%s3683_s26 + $0xb8] sm:$0xff] %v2347_v38  ;;  %v2366_v4 = vmul.f32 %v2715_v17, %v4202_v60  ;;  %v2367_v31 = vmul.f32 %v4205_v34, %v3853_v49  ;;  %v2368_v44 = vmul.f32 %v4202_v60, %v4519_v20  ;;  %v4521_v25 = vld [vmem:[#allocation33_spill] sm:$0xff]  ;;  %v4524_v21 = vld [vmem:[#allocation38_spill] sm:$0xff] }
 0x4c7   : > { %2412 = vst [vmem:[%s3683_s26 + $0xc0] sm:$0xff] %v2348_v54  ;;  %2413 = vst [vmem:[%s3683_s26 + $0xc8] sm:$0xff] %v2349_v27  ;;  %v2369_v28 = vmul.f32 %v4205_v34, %v3978_v47  ;;  %v2370_v51 = vmul.f32 %v4202_v60, %v4003_v24  ;;  %v2371_v49 = vmul.f32 %v4205_v34, %v4006_v6 }
 0x4c8   : > { %2414 = vst [vmem:[%s3683_s26 + $0xd0] sm:$0xff] %v2350_v52  ;;  %2415 = vst [vmem:[%s3683_s26 + $0xd8] sm:$0xff] %v2351_v37  ;;  %v2372_v41 = vmul.f32 %v4214_v8, %v4520_v5  ;;  %v2373_v47 = vmul.f32 %v4217_v11, %v3921_v33  ;;  %v2374_v24 = vmul.f32 %v2716_v50, %v4214_v8 }
 0x4c9   : > { %2416 = vst [vmem:[%s3683_s26 + $0xe0] sm:$0xff] %v2352_v42  ;;  %2417 = vst [vmem:[%s3683_s26 + $0xe8] sm:$0xff] %v2353_v56  ;;  %v2375_v6 = vmul.f32 %v4217_v11, %v3913_v61  ;;  %v2376_v60 = vmul.f32 %v4214_v8, %v4017_v32  ;;  %v2377_v33 = vmul.f32 %v4217_v11, %v4020_v57 }
 0x4ca   : > { %2418 = vst [vmem:[%s3683_s26 + $0xf0] sm:$0xff] %v2354_v23  ;;  %2419 = vst [vmem:[%s3683_s26 + $0xf8] sm:$0xff] %v2355_v7  ;;  %v2378_v34 = vmul.f32 %v4214_v8, %v4023_v40  ;;  %v2379_v61 = vmul.f32 %v4217_v11, %v4026_v16  ;;  %v2380_v32 = vmul.f32 %v4220_v12, %v4521_v25  ;;  %v4523_v8 = vld [vmem:[#allocation37_spill] sm:$0xff] }
 0x4cb   : > { %2420 = vst [vmem:[%s3683_s26 + $0x100] sm:$0xff] %v2356_v35  ;;  %2421 = vst [vmem:[%s3683_s26 + $0x108] sm:$0xff] %v2357_v53  ;;  %v2381_v57 = vmul.f32 %v4223_v15, %v3955_v63  ;;  %v2382_v40 = vmul.f32 %v4220_v12, %v4522_v43  ;;  %v2383_v16 = vmul.f32 %v4223_v15, %v4000_v55 }
 0x4cc   : > { %2422 = vst [vmem:[%s3683_s26 + $0x110] sm:$0xff] %v2358_v1  ;;  %2423 = vst [vmem:[%s3683_s26 + $0x118] sm:$0xff] %v2359_v59  ;;  %v2384_v63 = vmul.f32 %v4220_v12, %v4032_v22  ;;  %v2385_v11 = vmul.f32 %v4223_v15, %v4523_v8  ;;  %v2386_v38 = vmul.f32 %v4220_v12, %v4047_v18 }
 0x4cd   : > { %2424 = vst [vmem:[%s3683_s26 + $0x120] sm:$0xff] %v2360_v62  ;;  %2425 = vst [vmem:[%s3683_s26 + $0x128] sm:$0xff] %v2361_v45  ;;  %v2387_v54 = vmul.f32 %v4223_v15, %v4524_v21 }
 0x4ce   : > { %2426 = vst [vmem:[%s3683_s26 + $0x130] sm:$0xff] %v2362_v29  ;;  %2427 = vst [vmem:[%s3683_s26 + $0x138] sm:$0xff] %v2363_v36 }
 0x4cf   : > { %2428 = vst [vmem:[%s3683_s26 + $0x140] sm:$0xff] %v2364_v48  ;;  %2429 = vst [vmem:[%s3683_s26 + $0x148] sm:$0xff] %v2365_v39 }
 0x4d0   : > { %2430 = vst [vmem:[%s3683_s26 + $0x150] sm:$0xff] %v2366_v4  ;;  %2431 = vst [vmem:[%s3683_s26 + $0x158] sm:$0xff] %v2367_v31 }
 0x4d1   : > { %2432 = vst [vmem:[%s3683_s26 + $0x160] sm:$0xff] %v2368_v44  ;;  %2433 = vst [vmem:[%s3683_s26 + $0x168] sm:$0xff] %v2369_v28 }
 0x4d2   : > { %2434 = vst [vmem:[%s3683_s26 + $0x170] sm:$0xff] %v2370_v51  ;;  %2435 = vst [vmem:[%s3683_s26 + $0x178] sm:$0xff] %v2371_v49 }
 0x4d3   : > { %2436 = vst [vmem:[%s3683_s26 + $0x180] sm:$0xff] %v2372_v41  ;;  %2437 = vst [vmem:[%s3683_s26 + $0x188] sm:$0xff] %v2373_v47 }
 0x4d4   : > { %2438 = vst [vmem:[%s3683_s26 + $0x190] sm:$0xff] %v2374_v24  ;;  %2439 = vst [vmem:[%s3683_s26 + $0x198] sm:$0xff] %v2375_v6 }
 0x4d5   : > { %2440 = vst [vmem:[%s3683_s26 + $0x1a0] sm:$0xff] %v2376_v60  ;;  %2441 = vst [vmem:[%s3683_s26 + $0x1a8] sm:$0xff] %v2377_v33 }
 0x4d6   : > { %2442 = vst [vmem:[%s3683_s26 + $0x1b0] sm:$0xff] %v2378_v34  ;;  %2443 = vst [vmem:[%s3683_s26 + $0x1b8] sm:$0xff] %v2379_v61 }
 0x4d7   : > { %2444 = vst [vmem:[%s3683_s26 + $0x1c0] sm:$0xff] %v2380_v32  ;;  %2445 = vst [vmem:[%s3683_s26 + $0x1c8] sm:$0xff] %v2381_v57 }
 0x4d8   : > { %2446 = vst [vmem:[%s3683_s26 + $0x1d0] sm:$0xff] %v2382_v40  ;;  %2447 = vst [vmem:[%s3683_s26 + $0x1d8] sm:$0xff] %v2383_v16 }
 0x4d9   : > { %2448 = vst [vmem:[%s3683_s26 + $0x1e0] sm:$0xff] %v2384_v63  ;;  %2449 = vst [vmem:[%s3683_s26 + $0x1e8] sm:$0xff] %v2385_v11 }
 0x4da   : > { %2450 = vst [vmem:[%s3683_s26 + $0x1f0] sm:$0xff] %v2386_v38  ;;  %2451 = vst [vmem:[%s3683_s26 + $0x1f8] sm:$0xff] %v2387_v54 }
 0x4db PF: > { %s14_s15 = sadd.s32 1, %s2723_s15  }
 0x4dc   : > { %p11_p4 = scmp.ge.s32.totalorder %s14_s15, 4  }
 0x4de   :  { %13 = sbr.rel (!%p11_p4) target bundleno = 1 (0x1), region = 73 }

</bundles_post_ra>
